<compile_context>
chip_gen: v6e
topology: v6e:2x2x1
jax: 0.10.0
libtpu: 0.0.40
codegen_flags: <defaults>
</compile_context>

<pallas_src>
import functools

import jax
import jax.numpy as jnp
from jax.experimental import pallas as pl
from jax.experimental.pallas import tpu as pltpu

EPS = 1e-5


def _round_up(x, m):
    return ((x + m - 1) // m) * m


def _tpu_memory_config():
    """Generation-aware VMEM budget.

    v7x: 64 MiB / TC, 2 TCs -> keep headroom, prefer >= 2 grid steps.
    v5e/v6e: 128 MiB, 1 TC -> big tiles, no grid-step clamp.
    """
    vmem_cap = 64 * 1024 * 1024
    try:
        info = pltpu.get_tpu_info()
        vmem_cap = int(getattr(info, "vmem_capacity_bytes", vmem_cap))
    except Exception:
        pass
    two_core = vmem_cap <= 64 * 1024 * 1024
    vmem_limit = max(32 << 20, vmem_cap - (16 << 20))    # scoped VMEM limit
    vmem_target = max(24 << 20, vmem_limit - (8 << 20))  # tiling budget w/ headroom
    return vmem_limit, vmem_target, two_core


def _layernorm(v, w, b):
    # One-pass statistics: Var = E[x^2] - E[x]^2 (biased, matching F.layer_norm).
    d = v.shape[-1]
    s1 = jnp.sum(v, axis=-1, keepdims=True)
    s2 = jnp.sum(v * v, axis=-1, keepdims=True)
    mu = s1 * (1.0 / d)
    var = s2 * (1.0 / d) - mu * mu
    return (v - mu) * jax.lax.rsqrt(var + EPS) * w + b


def apmixer_block_kernel(
    x_ref,                       # (br, dim) in x's original dtype
    wm_ref,                      # (dim, dim)      bf16  merge weight
    cw1_ref, cw2_ref,            # (dim, hidden), (half, dim)  bf16  col MLP
    rw1_ref, rw2_ref,            # (dim, hidden), (half, dim)  bf16  row MLP
    vd_ref,                      # (7, dim)  f32: merge_b, col_ln_w, col_ln_b,
                                 #                col_b2, row_ln_w, row_ln_b, row_b2
    vh_ref,                      # (2, hidden) f32: col_b1, row_b1
    o_ref,
):
    half = cw2_ref.shape[0]

    # merge = nn.Linear(dim, dim); cast to bf16 in-kernel (free VPU filler).
    x16 = x_ref[...].astype(jnp.bfloat16)
    y = jnp.dot(x16, wm_ref[...], preferred_element_type=jnp.float32) + vd_ref[0:1, :]

    def branch(y, w1_ref, w2_ref, ln_w, ln_b, b1, b2):
        h = _layernorm(y, ln_w, ln_b)
        # Single N=hidden matmul for linear1 (full MXU column occupancy),
        # then a lane-aligned slice at `half` for the gate/value chunks.
        u = jnp.dot(h.astype(jnp.bfloat16), w1_ref[...],
                    preferred_element_type=jnp.float32) + b1
        g = u[:, :half]
        t = u[:, half:]
        p = g * (t * jax.nn.sigmoid(t))      # x1 * silu(x2), f32
        return y + jnp.dot(p.astype(jnp.bfloat16), w2_ref[...],
                           preferred_element_type=jnp.float32) + b2

    # col branch then row branch, each: y + MLP(LayerNorm(y))
    y = branch(y, cw1_ref, cw2_ref, vd_ref[1:2, :], vd_ref[2:3, :],
               vh_ref[0:1, :], vd_ref[3:4, :])
    y = branch(y, rw1_ref, rw2_ref, vd_ref[4:5, :], vd_ref[5:6, :],
               vh_ref[1:2, :], vd_ref[6:7, :])

    o_ref[...] = y.astype(o_ref.dtype)


def init_params(key, dim, hidden_dim=None, matmul_dtype=jnp.bfloat16):
    """Deterministic synthetic params.  PyTorch Linear weights are (out, in);
    we store them pre-transposed as (in, out), matmul weights cast to bf16,
    biases / LayerNorm affine params kept in f32 and packed into two small
    resident arrays."""
    hidden = hidden_dim or 2 * dim
    half = hidden // 2
    ks = jax.random.split(key, 9)
    scale = 0.05

    def lin(k, d_in, d_out):
        kw, kb = jax.random.split(k)
        w = scale * jax.random.normal(kw, (d_out, d_in), jnp.float32)   # torch (out, in)
        b = scale * jax.random.normal(kb, (d_out,), jnp.float32)
        return w, b

    wm, bm = lin(ks[0], dim, dim)
    col_w1, col_b1 = lin(ks[5], dim, hidden)   # linear1 (gate|value fused)
    col_w2, col_b2 = lin(ks[6], half, dim)     # linear2
    row_w1, row_b1 = lin(ks[7], dim, hidden)
    row_w2, row_b2 = lin(ks[8], half, dim)

    col_ln_w = 1.0 + scale * jax.random.normal(ks[1], (dim,), jnp.float32)
    col_ln_b = scale * jax.random.normal(ks[2], (dim,), jnp.float32)
    row_ln_w = 1.0 + scale * jax.random.normal(ks[3], (dim,), jnp.float32)
    row_ln_b = scale * jax.random.normal(ks[4], (dim,), jnp.float32)

    vec_d = jnp.stack(
        [bm, col_ln_w, col_ln_b, col_b2, row_ln_w, row_ln_b, row_b2]).astype(jnp.float32)
    vec_h = jnp.stack([col_b1, row_b1]).astype(jnp.float32)

    return {
        "merge_w": wm.T.astype(matmul_dtype),
        "col_w1": col_w1.T.astype(matmul_dtype),
        "col_w2": col_w2.T.astype(matmul_dtype),
        "row_w1": row_w1.T.astype(matmul_dtype),
        "row_w2": row_w2.T.astype(matmul_dtype),
        "vec_d": vec_d,
        "vec_h": vec_h,
    }


def _estimate_vmem_bytes(br, dim, hidden, in_bytes, out_bytes):
    """Rough VMEM footprint: bf16 weights (single-buffered) + packed f32 vectors
    + double-buffered in/out tiles + live f32/bf16 intermediates."""
    half = hidden // 2
    weights = 2 * (dim * dim + 2 * (dim * hidden + half * dim))          # bf16
    small = 4 * (7 * dim + 2 * hidden)                                   # f32 vectors
    io = 2 * br * dim * (in_bytes + out_bytes)                           # double-buffered tiles
    work = br * (4 * dim + 2 * hidden) * 4 + br * (dim + half) * 2       # intermediates
    return weights + small + io + work


def _pick_block_rows(M, requested, dim, hidden, row_align, vmem_target,
                     two_core, in_bytes, out_bytes):
    br = max(row_align, _round_up(requested, row_align))
    if two_core and M >= 2 * row_align:
        # v7x: 2 TensorCores split the "parallel" grid axis -> want >= 2 steps.
        br = min(br, _round_up(pl.cdiv(M, 2), row_align))
    br = min(br, _round_up(M, row_align))       # never larger than the row extent
    while br > row_align and _estimate_vmem_bytes(
            br, dim, hidden, in_bytes, out_bytes) > vmem_target:
        br = max(row_align, _round_up(br // 2, row_align))
    return br


_WEIGHT_ORDER = ("merge_w", "col_w1", "col_w2", "row_w1", "row_w2", "vec_d", "vec_h")


@functools.partial(jax.jit, static_argnames=("block_rows",))
def apmixer_block(x, params, frames=None, block_rows=1024):
    B, N, D = x.shape
    half = params["col_w2"].shape[0]
    hidden = params["col_w1"].shape[1]
    M = B * N

    in_bytes = jnp.dtype(x.dtype).itemsize
    out_bytes = in_bytes
    row_align = 8 if in_bytes >= 4 else 16      # f32 min tile (8,128); bf16 (16,128)

    vmem_limit, vmem_target, two_core = _tpu_memory_config()
    br = _pick_block_rows(M, block_rows, D, hidden, row_align, vmem_target,
                          two_core, in_bytes, out_bytes)

    # x_eq / x_inv split + cat is an identity -> no-op.  No dtype-cast pass:
    # the kernel casts to bf16 internally.  Pad at most row_align-1 rows so the
    # row extent meets the min-tile rule; ragged last *block* is handled by the
    # grid (masked stores; padded/garbage rows are row-independent).
    x2 = x.reshape(M, D)
    M_pad = _round_up(M, row_align)
    if M_pad != M:
        x2 = jnp.pad(x2, ((0, M_pad - M), (0, 0)))

    flat = [params[k] for k in _WEIGHT_ORDER]
    # Whole array resident in VMEM, single-buffered, no per-grid-step DMA.
    resident = pl.BlockSpec(memory_space=pltpu.MemorySpace.VMEM)

    flops = M_pad * (2 * D * D + 6 * D * hidden)
    transcendentals = M_pad * (2 * half + 2)
    weight_bytes = sum(int(a.size) * a.dtype.itemsize for a in flat)
    bytes_accessed = M_pad * D * (in_bytes + out_bytes) + weight_bytes

    out2 = pl.pallas_call(
        apmixer_block_kernel,
        out_shape=jax.ShapeDtypeStruct((M_pad, D), x.dtype),
        grid_spec=pltpu.PrefetchScalarGridSpec(
            num_scalar_prefetch=0,
            grid=(pl.cdiv(M_pad, br),),
            in_specs=[pl.BlockSpec((br, D), lambda i: (i, 0))] + [resident] * len(flat),
            out_specs=pl.BlockSpec((br, D), lambda i: (i, 0)),
        ),
        compiler_params=pltpu.CompilerParams(
            dimension_semantics=("parallel",),
            vmem_limit_bytes=vmem_limit,
        ),
        cost_estimate=pl.CostEstimate(
            flops=flops,
            transcendentals=transcendentals,
            bytes_accessed=bytes_accessed,
        ),
    )(x2, *flat)

    if M_pad != M:
        out2 = out2[:M]
    return out2.reshape(B, N, D), frames


def apmixer_block_ref(x, params, frames=None):
    """Pure-JAX reference mirroring the kernel numerics (bf16 MXU operands,
    f32 accumulation, two-pass LayerNorm), matching the PyTorch forward up to
    bf16 rounding."""
    B, N, D = x.shape
    half = params["col_w2"].shape[0]
    vd, vh = params["vec_d"], params["vec_h"]

    v = x.reshape(B * N, D).astype(jnp.bfloat16)
    y = jnp.dot(v, params["merge_w"], preferred_element_type=jnp.float32) + vd[0]

    def ln(v, w, b):
        mu = jnp.mean(v, axis=-1, keepdims=True)
        var = jnp.mean((v - mu) ** 2, axis=-1, keepdims=True)
        return (v - mu) * jax.lax.rsqrt(var + EPS) * w + b

    def branch(y, w1, w2, ln_w, ln_b, b1, b2):
        h = ln(y, ln_w, ln_b)
        u = jnp.dot(h.astype(jnp.bfloat16), w1, preferred_element_type=jnp.float32) + b1
        g, t = u[:, :half], u[:, half:]
        p = g * (t * jax.nn.sigmoid(t))
        return y + jnp.dot(p.astype(jnp.bfloat16), w2,
                           preferred_element_type=jnp.float32) + b2

    y = branch(y, params["col_w1"], params["col_w2"], vd[1], vd[2], vh[0], vd[3])
    y = branch(y, params["row_w1"], params["row_w2"], vd[4], vd[5], vh[1], vd[6])
    return y.reshape(B, N, D).astype(x.dtype), frames


if __name__ == "__main__":
    # batch=2, n_residues=64, dim=128 (hidden = 2*dim = 256): small but lane-dense.
    B, N, DIM = 2, 64, 128
    key = jax.random.PRNGKey(0)
    kx, kp = jax.random.split(key)

    x = jax.random.normal(kx, (B, N, DIM), jnp.float32)
    params = init_params(kp, DIM)

    out, frames = apmixer_block(x, params, frames=None)
    out = jax.block_until_ready(out)

    ref, _ = apmixer_block_ref(x, params)
    assert out.shape == (B, N, DIM)
    max_err = float(jnp.max(jnp.abs(out - ref)))
    assert jnp.allclose(out, ref, atol=1e-2, rtol=1e-2), f"mismatch vs reference: {max_err}"

    print("KERNEL_OK")
</pallas_src>

<mosaic_0001>
module attributes {stable_mosaic.version = 11 : i64} {
  func.func @apmixer_block_kernel(%arg0: i32, %arg1: memref<64x128xf32, #tpu.memory_space<vmem>>, %arg2: memref<128x128xbf16, #tpu.memory_space<vmem>>, %arg3: memref<128x256xbf16, #tpu.memory_space<vmem>>, %arg4: memref<128x128xbf16, #tpu.memory_space<vmem>>, %arg5: memref<128x256xbf16, #tpu.memory_space<vmem>>, %arg6: memref<128x128xbf16, #tpu.memory_space<vmem>>, %arg7: memref<7x128xf32, #tpu.memory_space<vmem>>, %arg8: memref<2x256xf32, #tpu.memory_space<vmem>>, %arg9: memref<64x128xf32, #tpu.memory_space<vmem>>) attributes {dimension_semantics = [#tpu.dimension_semantics<parallel>], iteration_bounds = array<i64: 2>, scalar_prefetch = 0 : i64, scratch_operands = 0 : i64, tpu.core_type = #tpu.core_type<tc>, window_params = [{transform_indices = @transform_0, window_bounds = array<i64: 64, 128>}, {pipeline_mode = #tpu.pipeline_mode<synchronous>, transform_indices = @transform_1, window_bounds = array<i64: 128, 128>}, {pipeline_mode = #tpu.pipeline_mode<synchronous>, transform_indices = @transform_2, window_bounds = array<i64: 128, 256>}, {pipeline_mode = #tpu.pipeline_mode<synchronous>, transform_indices = @transform_3, window_bounds = array<i64: 128, 128>}, {pipeline_mode = #tpu.pipeline_mode<synchronous>, transform_indices = @transform_4, window_bounds = array<i64: 128, 256>}, {pipeline_mode = #tpu.pipeline_mode<synchronous>, transform_indices = @transform_5, window_bounds = array<i64: 128, 128>}, {pipeline_mode = #tpu.pipeline_mode<synchronous>, transform_indices = @transform_6, window_bounds = array<i64: 7, 128>}, {pipeline_mode = #tpu.pipeline_mode<synchronous>, transform_indices = @transform_7, window_bounds = array<i64: 2, 256>}, {transform_indices = @transform_8, window_bounds = array<i64: 64, 128>}]} {
    %c0 = arith.constant 0 : index
    %c0_0 = arith.constant 0 : index
    %0 = vector.load %arg1[%c0, %c0_0] : memref<64x128xf32, #tpu.memory_space<vmem>>, vector<64x128xf32>
    %1 = arith.truncf %0 : vector<64x128xf32> to vector<64x128xbf16>
    %c0_1 = arith.constant 0 : index
    %c0_2 = arith.constant 0 : index
    %2 = vector.load %arg2[%c0_1, %c0_2] : memref<128x128xbf16, #tpu.memory_space<vmem>>, vector<128x128xbf16>
    %cst = arith.constant dense<0.000000e+00> : vector<64x128xf32>
    %3 = tpu.matmul %1, %2, %cst {dimension_numbers = #tpu.dot_dimension_numbers<[1], [0], [0], [1], [0, 0, 1, 1], [], []>} : vector<64x128xbf16>, vector<128x128xbf16>, vector<64x128xf32> -> vector<64x128xf32>
    %c0_3 = arith.constant 0 : index
    %c0_4 = arith.constant 0 : index
    %4 = vector.load %arg7[%c0_3, %c0_4] : memref<7x128xf32, #tpu.memory_space<vmem>>, vector<1x128xf32>
    %5 = vector.broadcast %4 : vector<1x128xf32> to vector<64x128xf32>
    %6 = arith.addf %3, %5 : vector<64x128xf32>
    %c1 = arith.constant 1 : index
    %c0_5 = arith.constant 0 : index
    %7 = vector.load %arg7[%c1, %c0_5] : memref<7x128xf32, #tpu.memory_space<vmem>>, vector<1x128xf32>
    %c2 = arith.constant 2 : index
    %c0_6 = arith.constant 0 : index
    %8 = vector.load %arg7[%c2, %c0_6] : memref<7x128xf32, #tpu.memory_space<vmem>>, vector<1x128xf32>
    %c0_7 = arith.constant 0 : index
    %c0_8 = arith.constant 0 : index
    %9 = vector.load %arg8[%c0_7, %c0_8] : memref<2x256xf32, #tpu.memory_space<vmem>>, vector<1x256xf32>
    %c3 = arith.constant 3 : index
    %c0_9 = arith.constant 0 : index
    %10 = vector.load %arg7[%c3, %c0_9] : memref<7x128xf32, #tpu.memory_space<vmem>>, vector<1x128xf32>
    %cst_10 = arith.constant dense<0.000000e+00> : vector<64xf32>
    %11 = vector.multi_reduction <add>, %6, %cst_10 [1] : vector<64x128xf32> to vector<64xf32>
    %12 = vector.shape_cast %11 : vector<64xf32> to vector<64x1xf32>
    %13 = arith.mulf %6, %6 : vector<64x128xf32>
    %cst_11 = arith.constant dense<0.000000e+00> : vector<64xf32>
    %14 = vector.multi_reduction <add>, %13, %cst_11 [1] : vector<64x128xf32> to vector<64xf32>
    %15 = vector.shape_cast %14 : vector<64xf32> to vector<64x1xf32>
    %cst_12 = arith.constant 7.812500e-03 : f32
    %16 = vector.broadcast %cst_12 : f32 to vector<64x1xf32>
    %17 = arith.mulf %12, %16 : vector<64x1xf32>
    %cst_13 = arith.constant 7.812500e-03 : f32
    %18 = vector.broadcast %cst_13 : f32 to vector<64x1xf32>
    %19 = arith.mulf %15, %18 : vector<64x1xf32>
    %20 = arith.mulf %17, %17 : vector<64x1xf32>
    %21 = arith.subf %19, %20 : vector<64x1xf32>
    %22 = vector.broadcast %17 : vector<64x1xf32> to vector<64x128xf32>
    %23 = arith.subf %6, %22 : vector<64x128xf32>
    %cst_14 = arith.constant 9.99999974E-6 : f32
    %24 = vector.broadcast %cst_14 : f32 to vector<64x1xf32>
    %25 = arith.addf %21, %24 : vector<64x1xf32>
    %26 = math.rsqrt %25 : vector<64x1xf32>
    %27 = vector.broadcast %26 : vector<64x1xf32> to vector<64x128xf32>
    %28 = arith.mulf %23, %27 : vector<64x128xf32>
    %29 = vector.broadcast %7 : vector<1x128xf32> to vector<64x128xf32>
    %30 = arith.mulf %28, %29 : vector<64x128xf32>
    %31 = vector.broadcast %8 : vector<1x128xf32> to vector<64x128xf32>
    %32 = arith.addf %30, %31 : vector<64x128xf32>
    %33 = arith.truncf %32 : vector<64x128xf32> to vector<64x128xbf16>
    %c0_15 = arith.constant 0 : index
    %c0_16 = arith.constant 0 : index
    %34 = vector.load %arg3[%c0_15, %c0_16] : memref<128x256xbf16, #tpu.memory_space<vmem>>, vector<128x256xbf16>
    %cst_17 = arith.constant dense<0.000000e+00> : vector<64x256xf32>
    %35 = tpu.matmul %33, %34, %cst_17 {dimension_numbers = #tpu.dot_dimension_numbers<[1], [0], [0], [1], [0, 0, 1, 1], [], []>} : vector<64x128xbf16>, vector<128x256xbf16>, vector<64x256xf32> -> vector<64x256xf32>
    %36 = vector.broadcast %9 : vector<1x256xf32> to vector<64x256xf32>
    %37 = arith.addf %35, %36 : vector<64x256xf32>
    %38 = vector.extract_strided_slice %37 {offsets = [0, 0], sizes = [64, 128], strides = [1, 1]} : vector<64x256xf32> to vector<64x128xf32>
    %39 = vector.extract_strided_slice %37 {offsets = [0, 128], sizes = [64, 128], strides = [1, 1]} : vector<64x256xf32> to vector<64x128xf32>
    %40 = arith.negf %39 : vector<64x128xf32>
    %41 = math.exp %40 : vector<64x128xf32>
    %cst_18 = arith.constant 1.000000e+00 : f32
    %42 = vector.broadcast %cst_18 : f32 to vector<64x128xf32>
    %43 = arith.addf %42, %41 : vector<64x128xf32>
    %44 = arith.divf %42, %43 : vector<64x128xf32>
    %45 = arith.mulf %39, %44 : vector<64x128xf32>
    %46 = arith.mulf %38, %45 : vector<64x128xf32>
    %47 = arith.truncf %46 : vector<64x128xf32> to vector<64x128xbf16>
    %c0_19 = arith.constant 0 : index
    %c0_20 = arith.constant 0 : index
    %48 = vector.load %arg4[%c0_19, %c0_20] : memref<128x128xbf16, #tpu.memory_space<vmem>>, vector<128x128xbf16>
    %cst_21 = arith.constant dense<0.000000e+00> : vector<64x128xf32>
    %49 = tpu.matmul %47, %48, %cst_21 {dimension_numbers = #tpu.dot_dimension_numbers<[1], [0], [0], [1], [0, 0, 1, 1], [], []>} : vector<64x128xbf16>, vector<128x128xbf16>, vector<64x128xf32> -> vector<64x128xf32>
    %50 = arith.addf %6, %49 : vector<64x128xf32>
    %51 = vector.broadcast %10 : vector<1x128xf32> to vector<64x128xf32>
    %52 = arith.addf %50, %51 : vector<64x128xf32>
    %c4 = arith.constant 4 : index
    %c0_22 = arith.constant 0 : index
    %53 = vector.load %arg7[%c4, %c0_22] : memref<7x128xf32, #tpu.memory_space<vmem>>, vector<1x128xf32>
    %c5 = arith.constant 5 : index
    %c0_23 = arith.constant 0 : index
    %54 = vector.load %arg7[%c5, %c0_23] : memref<7x128xf32, #tpu.memory_space<vmem>>, vector<1x128xf32>
    %c1_24 = arith.constant 1 : index
    %c0_25 = arith.constant 0 : index
    %55 = vector.load %arg8[%c1_24, %c0_25] : memref<2x256xf32, #tpu.memory_space<vmem>>, vector<1x256xf32>
    %c6 = arith.constant 6 : index
    %c0_26 = arith.constant 0 : index
    %56 = vector.load %arg7[%c6, %c0_26] : memref<7x128xf32, #tpu.memory_space<vmem>>, vector<1x128xf32>
    %cst_27 = arith.constant dense<0.000000e+00> : vector<64xf32>
    %57 = vector.multi_reduction <add>, %52, %cst_27 [1] : vector<64x128xf32> to vector<64xf32>
    %58 = vector.shape_cast %57 : vector<64xf32> to vector<64x1xf32>
    %59 = arith.mulf %52, %52 : vector<64x128xf32>
    %cst_28 = arith.constant dense<0.000000e+00> : vector<64xf32>
    %60 = vector.multi_reduction <add>, %59, %cst_28 [1] : vector<64x128xf32> to vector<64xf32>
    %61 = vector.shape_cast %60 : vector<64xf32> to vector<64x1xf32>
    %cst_29 = arith.constant 7.812500e-03 : f32
    %62 = vector.broadcast %cst_29 : f32 to vector<64x1xf32>
    %63 = arith.mulf %58, %62 : vector<64x1xf32>
    %cst_30 = arith.constant 7.812500e-03 : f32
    %64 = vector.broadcast %cst_30 : f32 to vector<64x1xf32>
    %65 = arith.mulf %61, %64 : vector<64x1xf32>
    %66 = arith.mulf %63, %63 : vector<64x1xf32>
    %67 = arith.subf %65, %66 : vector<64x1xf32>
    %68 = vector.broadcast %63 : vector<64x1xf32> to vector<64x128xf32>
    %69 = arith.subf %52, %68 : vector<64x128xf32>
    %cst_31 = arith.constant 9.99999974E-6 : f32
    %70 = vector.broadcast %cst_31 : f32 to vector<64x1xf32>
    %71 = arith.addf %67, %70 : vector<64x1xf32>
    %72 = math.rsqrt %71 : vector<64x1xf32>
    %73 = vector.broadcast %72 : vector<64x1xf32> to vector<64x128xf32>
    %74 = arith.mulf %69, %73 : vector<64x128xf32>
    %75 = vector.broadcast %53 : vector<1x128xf32> to vector<64x128xf32>
    %76 = arith.mulf %74, %75 : vector<64x128xf32>
    %77 = vector.broadcast %54 : vector<1x128xf32> to vector<64x128xf32>
    %78 = arith.addf %76, %77 : vector<64x128xf32>
    %79 = arith.truncf %78 : vector<64x128xf32> to vector<64x128xbf16>
    %c0_32 = arith.constant 0 : index
    %c0_33 = arith.constant 0 : index
    %80 = vector.load %arg5[%c0_32, %c0_33] : memref<128x256xbf16, #tpu.memory_space<vmem>>, vector<128x256xbf16>
    %cst_34 = arith.constant dense<0.000000e+00> : vector<64x256xf32>
    %81 = tpu.matmul %79, %80, %cst_34 {dimension_numbers = #tpu.dot_dimension_numbers<[1], [0], [0], [1], [0, 0, 1, 1], [], []>} : vector<64x128xbf16>, vector<128x256xbf16>, vector<64x256xf32> -> vector<64x256xf32>
    %82 = vector.broadcast %55 : vector<1x256xf32> to vector<64x256xf32>
    %83 = arith.addf %81, %82 : vector<64x256xf32>
    %84 = vector.extract_strided_slice %83 {offsets = [0, 0], sizes = [64, 128], strides = [1, 1]} : vector<64x256xf32> to vector<64x128xf32>
    %85 = vector.extract_strided_slice %83 {offsets = [0, 128], sizes = [64, 128], strides = [1, 1]} : vector<64x256xf32> to vector<64x128xf32>
    %86 = arith.negf %85 : vector<64x128xf32>
    %87 = math.exp %86 : vector<64x128xf32>
    %cst_35 = arith.constant 1.000000e+00 : f32
    %88 = vector.broadcast %cst_35 : f32 to vector<64x128xf32>
    %89 = arith.addf %88, %87 : vector<64x128xf32>
    %90 = arith.divf %88, %89 : vector<64x128xf32>
    %91 = arith.mulf %85, %90 : vector<64x128xf32>
    %92 = arith.mulf %84, %91 : vector<64x128xf32>
    %93 = arith.truncf %92 : vector<64x128xf32> to vector<64x128xbf16>
    %c0_36 = arith.constant 0 : index
    %c0_37 = arith.constant 0 : index
    %94 = vector.load %arg6[%c0_36, %c0_37] : memref<128x128xbf16, #tpu.memory_space<vmem>>, vector<128x128xbf16>
    %cst_38 = arith.constant dense<0.000000e+00> : vector<64x128xf32>
    %95 = tpu.matmul %93, %94, %cst_38 {dimension_numbers = #tpu.dot_dimension_numbers<[1], [0], [0], [1], [0, 0, 1, 1], [], []>} : vector<64x128xbf16>, vector<128x128xbf16>, vector<64x128xf32> -> vector<64x128xf32>
    %96 = arith.addf %52, %95 : vector<64x128xf32>
    %97 = vector.broadcast %56 : vector<1x128xf32> to vector<64x128xf32>
    %98 = arith.addf %96, %97 : vector<64x128xf32>
    %c0_39 = arith.constant 0 : index
    %c0_40 = arith.constant 0 : index
    %99 = vector.load %arg9[%c0_39, %c0_40] : memref<64x128xf32, #tpu.memory_space<vmem>>, vector<64x128xf32>
    tpu.vector_store %arg9[%c0_39, %c0_40], %98 {strides = array<i32>} : memref<64x128xf32, #tpu.memory_space<vmem>>, vector<64x128xf32>,
    return
  }
  func.func @transform_0(%arg0: i32) -> (i32, i32) {
    %c0_i32 = arith.constant 0 : i32
    %c0_i32_0 = arith.constant 0 : i32
    return %arg0, %c0_i32 : i32, i32
  }
  func.func @transform_1(%arg0: i32) -> (i32, i32) {
    %c0_i32 = arith.constant 0 : i32
    %c0_i32_0 = arith.constant 0 : i32
    %c0_i32_1 = arith.constant 0 : i32
    return %c0_i32, %c0_i32_0 : i32, i32
  }
  func.func @transform_2(%arg0: i32) -> (i32, i32) {
    %c0_i32 = arith.constant 0 : i32
    %c0_i32_0 = arith.constant 0 : i32
    %c0_i32_1 = arith.constant 0 : i32
    return %c0_i32, %c0_i32_0 : i32, i32
  }
  func.func @transform_3(%arg0: i32) -> (i32, i32) {
    %c0_i32 = arith.constant 0 : i32
    %c0_i32_0 = arith.constant 0 : i32
    %c0_i32_1 = arith.constant 0 : i32
    return %c0_i32, %c0_i32_0 : i32, i32
  }
  func.func @transform_4(%arg0: i32) -> (i32, i32) {
    %c0_i32 = arith.constant 0 : i32
    %c0_i32_0 = arith.constant 0 : i32
    %c0_i32_1 = arith.constant 0 : i32
    return %c0_i32, %c0_i32_0 : i32, i32
  }
  func.func @transform_5(%arg0: i32) -> (i32, i32) {
    %c0_i32 = arith.constant 0 : i32
    %c0_i32_0 = arith.constant 0 : i32
    %c0_i32_1 = arith.constant 0 : i32
    return %c0_i32, %c0_i32_0 : i32, i32
  }
  func.func @transform_6(%arg0: i32) -> (i32, i32) {
    %c0_i32 = arith.constant 0 : i32
    %c0_i32_0 = arith.constant 0 : i32
    %c0_i32_1 = arith.constant 0 : i32
    return %c0_i32, %c0_i32_0 : i32, i32
  }
  func.func @transform_7(%arg0: i32) -> (i32, i32) {
    %c0_i32 = arith.constant 0 : i32
    %c0_i32_0 = arith.constant 0 : i32
    %c0_i32_1 = arith.constant 0 : i32
    return %c0_i32, %c0_i32_0 : i32, i32
  }
  func.func @transform_8(%arg0: i32) -> (i32, i32) {
    %c0_i32 = arith.constant 0 : i32
    %c0_i32_0 = arith.constant 0 : i32
    return %arg0, %c0_i32 : i32, i32
  }
}

</mosaic_0001>

<bundles_post_ra>
// kernel: apmixer_block.1
= control target key start
LH: loop header
LB: loop body
LE: loop exit
PB: predicated region body
PF: predicated region fallthrough
CT: control target
= control target key end

     0   :  { %s3038_s0 = inlined_call_operand.hbm [shape: f32[128,128], index: 0, kind: input, shape index: {}]   ;;  %s3039_s1 = inlined_call_operand.hbm [shape: bf16[128,128], index: 1, kind: input, shape index: {}]   ;;  %s3040_s2 = inlined_call_operand.hbm [shape: bf16[128,256], index: 2, kind: input, shape index: {}]   ;;  %s3041_s3 = inlined_call_operand.hbm [shape: bf16[128,128], index: 3, kind: input, shape index: {}]   ;;  %s3042_s4 = inlined_call_operand.hbm [shape: bf16[128,256], index: 4, kind: input, shape index: {}]   ;;  %s3043_s5 = inlined_call_operand.hbm [shape: bf16[128,128], index: 5, kind: input, shape index: {}]   ;;  %s3044_s6 = inlined_call_operand.vmem [shape: f32[7,128], index: 6, kind: input, shape index: {}]   ;;  %s3045_s7 = inlined_call_operand.vmem [shape: f32[2,256], index: 7, kind: input, shape index: {}]   ;;  %s3046_s8 = inlined_call_operand.hbm [shape: f32[128,128], index: 8, kind: output, shape index: {}]  }
   0x1   :  { %3053 = sst [smem:[#allocation19_spill]] %s3039_s1 }
   0x2   :  { %3054 = sst [smem:[#allocation20_spill]] %s3040_s2 }
   0x3   :  { %13 = vsyncpa [#allocation3], 0 }
   0x4   :  { %15 = vsyncpa [#allocation3 + $0x1], 0 }
   0x5   :  { %16 = vsyncpa [#allocation6], 0 }
   0x6   :  { %17 = vsyncpa [#allocation9], 0 }
   0x7   :  { %18 = vsyncpa [#allocation12], 0 }
   0x8   :  { %19 = vsyncpa [#allocation4], 0 }
   0x9   :  { %21 = vsyncpa [#allocation4 + $0x1], 0  ;;  %s2553_s27 = smov 0   ;;  %s2555_s28 = smov 0  }
   0xa   :  { %s2557_s29 = smov 0   ;;  %s2559_s30 = smov 0  }
   0xb LB: > { %s2494_s9 = smov [#allocation5]   ;;  %s2574_s11 = sadd.s32 4294967295, %s2492_s30   ;;  %s2492_s30 = sphi %s2559_s30, %s3080_s30   ;;  %s2488_s29 = sphi %s2557_s29, %s3079_s29   ;;  %s2484_s28 = sphi %s2555_s28, %s3078_s28   ;;  %s2480_s27 = sphi %s2553_s27, %s3077_s27  }
   0xc   : > { %s243_s10 = sshll.u32 %s2494_s9, 4  ;;  %p1757_p0 = scmp.ge.s32.totalorder %s2492_s30, 1  ;;  %s244_s10 = int_to_ptr.vmem [resolvable:$true] %s243_s10 }
   0xd   : > { %p3049_p1 = scmp.eq.s32.totalorder %s2574_s11, 0  ;;  %p231_p2 = scmp.lt.s32.totalorder %s2492_s30, 3 }
   0xe   : > { %s2495_s13 = smov [#allocation8]   ;;  %s2496_s16 = smov [#allocation7]  }
   0xf   : > { %p2579_p3 = pnand %p1757_p0, %p231_p2  ;;  %s269_s14 = sshll.u32 %s2495_s13, 4  ;;  %s2592_s14 = int_to_ptr.vmem [resolvable:$true] %s269_s14 }
  0x10   : > { %s256_s17 = sshll.u32 %s2496_s16, 4  ;;  %s2269_s19 = scalar_lea.vmem %s244_s10, 1024  ;;  %s2594_s17 = int_to_ptr.vmem [resolvable:$true] %s256_s17 }
  0x11   : > { %s3055_s12 = scalar_select %p2579_p3, 1, 0 }
  0x12   : > { %p2010_p5 = pneg %p2579_p3  ;;  %p2270_p8 = scmp.ne.s32.totalorder %s244_s10, %s2269_s19 }
  0x13   : > { %p2277_p11 = scmp.lt.s32.totalorder %s244_s10, %s244_s10  ;;  %p2278_p12 = scmp.lt.s32.totalorder %s2269_s19, %s2269_s19 }
  0x14   : > { %p2588_p6 = pnand %p2010_p5, %p3049_p1 }
  0x15   : > { %p2279_p13 = por %p2278_p12, %p2277_p11 }
  0x16   : > { %p2598_p7 = pneg %p2588_p6 }
  0x18   : > { %p2272_p9 = pnand %p2270_p8, %p2598_p7 }
  0x1a   : > { %p2273_p10 = pneg %p2272_p9 }
  0x1c   : > { %p2280_p0 = pnand %p2279_p13, %p2273_p10 }
  0x1e   : > { %2283 = shalt.err (!%p2280_p0)
}
  0x1f   : > { %s2497_s20 = smov 64   ;;  %s2498_s21 = smov 4  }
  0x20   : > { %s3058_s1 = sld [smem:[#allocation19_spill]]  ;;  %s2295_s24 = scalar_lea.vmem %s2592_s14, 1024 }
  0x21   : > { %p2296_p2 = scmp.ne.s32.totalorder %s2592_s14, %s2295_s24  ;;  %p2303_p9 = scmp.lt.s32.totalorder %s2592_s14, %s2592_s14 }
  0x22   : > { %p2304_p10 = scmp.lt.s32.totalorder %s2295_s24, %s2295_s24 }
  0x23   : > { %p2298_p5 = pnand %p2296_p2, %p2598_p7 }
  0x24   : > { %p2305_p11 = por %p2304_p10, %p2303_p9 }
  0x25   : > { %p2299_p8 = pneg %p2298_p5 }
  0x26   : > { %2013 = dma.hbm_to_vmem [thread:$0]  (!%p2588_p6), %s3058_s1, 1024, %s244_s10, [#allocation6], %s2497_s20, %s2497_s20, %s2498_s21  }
  0x27   : > { %p2306_p12 = pnand %p2305_p11, %p2299_p8 }
  0x29   : > { %2309 = shalt.err (!%p2306_p12)
}
  0x2a   : > { %2019 = dma.hbm_to_vmem [thread:$0]  (!%p2588_p6), %s3041_s3, 1024, %s2592_s14, [#allocation9], %s2497_s20, %s2497_s20, %s2498_s21  }
  0x2b   : > { %s2321_s9 = scalar_lea.vmem %s2594_s17, 2048  ;;  %p2329_p5 = scmp.lt.s32.totalorder %s2594_s17, %s2594_s17 }
  0x2c   : > { %p2322_p13 = scmp.ne.s32.totalorder %s2594_s17, %s2321_s9  ;;  %p2330_p8 = scmp.lt.s32.totalorder %s2321_s9, %s2321_s9 }
  0x2e   : > { %p2324_p0 = pnand %p2322_p13, %p2598_p7  ;;  %p2331_p9 = por %p2330_p8, %p2329_p5 }
  0x30   : > { %p2325_p2 = pneg %p2324_p0 }
  0x32   : > { %p2332_p10 = pnand %p2331_p9, %p2325_p2 }
  0x34   : > { %2335 = shalt.err (!%p2332_p10)
}
  0x35   : > { %s3047_s10 = smov 128   ;;  %s3048_s13 = smov 8  }
  0x36   : > { %s3059_s2 = sld [smem:[#allocation20_spill]]  ;;  %s2501_s19 = smov [#allocation10]  }
  0x37   : > { %s282_s22 = sshll.u32 %s2501_s19, 4  ;;  %s2502_s23 = smov [#allocation11]   ;;  %s283_s22 = int_to_ptr.vmem [resolvable:$true] %s282_s22 }
  0x38   : > { %s295_s24 = sshll.u32 %s2502_s23, 4  ;;  %s2347_s25 = scalar_lea.vmem %s283_s22, 2048  ;;  %s296_s24 = int_to_ptr.vmem [resolvable:$true] %s295_s24 }
  0x39   : > { %p2348_p11 = scmp.ne.s32.totalorder %s283_s22, %s2347_s25  ;;  %p2355_p0 = scmp.lt.s32.totalorder %s283_s22, %s283_s22 }
  0x3a   : > { %p2356_p2 = scmp.lt.s32.totalorder %s2347_s25, %s2347_s25 }
  0x3b   : > { %p2350_p12 = pnand %p2348_p11, %p2598_p7 }
  0x3c   : > { %2016 = dma.hbm_to_vmem [thread:$0]  (!%p2588_p6), %s3059_s2, 2048, %s2594_s17, [#allocation6], %s3047_s10, %s3047_s10, %s3048_s13  }
  0x3d   : > { %p2351_p13 = pneg %p2350_p12  ;;  %p2357_p5 = por %p2356_p2, %p2355_p0 }
  0x3f   : > { %p2358_p8 = pnand %p2357_p5, %p2351_p13 }
  0x41   : > { %2361 = shalt.err (!%p2358_p8)
}
  0x42   : > { %2022 = dma.hbm_to_vmem [thread:$0]  (!%p2588_p6), %s3042_s4, 2048, %s283_s22, [#allocation9], %s3047_s10, %s3047_s10, %s3048_s13  }
  0x43   : > { %s2373_s9 = scalar_lea.vmem %s296_s24, 1024  ;;  %p2381_p12 = scmp.lt.s32.totalorder %s296_s24, %s296_s24 }
  0x44   : > { %p2374_p9 = scmp.ne.s32.totalorder %s296_s24, %s2373_s9  ;;  %p2382_p0 = scmp.lt.s32.totalorder %s2373_s9, %s2373_s9 }
  0x46   : > { %p2376_p10 = pnand %p2374_p9, %p2598_p7  ;;  %p2383_p13 = por %p2382_p0, %p2381_p12 }
  0x48   : > { %p2377_p11 = pneg %p2376_p10 }
  0x4a   : > { %p2384_p2 = pnand %p2383_p13, %p2377_p11 }
  0x4c   : > { %2387 = shalt.err (!%p2384_p2)
}
  0x4d   : > { %2025 = dma.hbm_to_vmem [thread:$0]  (!%p2588_p6), %s3043_s5, 1024, %s296_s24, [#allocation12], %s2497_s20, %s2497_s20, %s2498_s21  }
  0x4e   : > { %s1756_s15 = sadd.s32 4294967294, %s2492_s30   ;;  %s2664_s18 = sadd.s32 1, %s2492_s30  }
  0x4f   : > { %s34_s19 = sadd.s32 1, %s2488_s29  ;;  %s31_s22 = ssub.s32 %s2492_s30, %s2664_s18 }
  0x50   : > { %p41_p7 = scmp.ne.s32.totalorder %s2488_s29, %s2484_s28  ;;  %p32_p5 = scmp.eq.s32.totalorder %s31_s22, 0 }
  0x51   : > { %p42_p8 = scmp.eq.s32.totalorder %s2492_s30, 0  ;;  %p47_p9 = scmp.ne.s32.totalorder %s2484_s28, %s2480_s27 }
  0x52   : > { %p218_p10 = scmp.eq.s32.totalorder %s2574_s11, 1  ;;  %p224_p0 = scmp.eq.s32.totalorder %s1756_s15, 1 }
  0x53   : > { %s2676_s23 = scalar_select %p32_p5, %s2488_s29, %s34_s19  }
  0x54   : > { %p43_p11 = por %p42_p8, %p41_p7  ;;  %p2680_p12 = por %p3049_p1, %p47_p9 }
  0x55   : > { %p2684_p6 = por %p218_p10, %p41_p7  ;;  %p2039_p13 = scmp.lt.s32.totalorder %s2492_s30, 2 }
  0x56   : > { %s3060_s25 = scalar_select %p2680_p12, 1, 0 }
  0x57   : > { %s3061_s20 = scalar_select %p2684_p6, 1, 0 }
  0x58   : > { %s315_s21 = sand.u32 1, %s2488_s29   ;;  %p2690_p2 = por %p224_p0, %p47_p9 }
  0x59   : > { %s1764_s17 = sshll.u32 %s315_s21, 6  ;;  %s1860_s26 = sshll.u32 %s2492_s30, 10 }
  0x5a   : > { %s3062_s24 = scalar_select %p2690_p2, 1, 0 }
  0x5b   : > { %s2698_s16 = scalar_lea.hbm %s3038_s0, %s1860_s26  ;;  %s319_s19 = scalar_lea.vmem [#allocation2], %s1764_s17 }
  0x5c   : > { %s326_s22 = sshll.u32 %s319_s19, 4  ;;  %p2700_p7 = pnand %p2039_p13, %p43_p11  ;;  %s2704_s22 = int_to_ptr.vmem [resolvable:$true] %s326_s22 }
  0x5d   : > { %s2706_s10 = scalar_lea.sflag [#allocation3], %s315_s21  ;;  %s2388_s13 = scalar_lea.hbm %s2698_s16, 1024 }
  0x5e   : > { %p2389_p5 = scmp.ne.s32.totalorder %s2698_s16, %s2388_s13  ;;  %p2390_p8 = pneg %p2700_p7 }
  0x5f   : > { %s2393_s17 = scalar_lea.hbm %s3038_s0, 2048  ;;  %p2394_p11 = scmp.lt.s32.totalorder %s2698_s16, %s3038_s0 }
  0x60   : > { %p2391_p9 = pnand %p2390_p8, %p2389_p5  ;;  %p2395_p0 = scmp.lt.s32.totalorder %s2393_s17, %s2388_s13 }
  0x62   : > { %p2392_p10 = pneg %p2391_p9  ;;  %p2396_p13 = por %p2395_p0, %p2394_p11 }
  0x64   : > { %p2397_p4 = pnand %p2396_p13, %p2392_p10 }
  0x66   : > { %2400 = shalt.err (!%p2397_p4)
}
  0x67   : > { %s2401_s21 = scalar_lea.vmem %s2704_s22, 1024  ;;  %s2503_s1 = smov [#allocation2]  }
  0x68   : > { %p2402_p1 = scmp.ne.s32.totalorder %s2704_s22, %s2401_s21  ;;  %s2406_s2 = sshll.u32 %s2503_s1, 4  ;;  %s2407_s2 = int_to_ptr.vmem [resolvable:$false] %s2406_s2 }
  0x69   : > { %s2408_s26 = scalar_lea.vmem %s2407_s2, 2048  ;;  %p2409_p9 = scmp.lt.s32.totalorder %s2704_s22, %s2407_s2 }
  0x6a   : > { %p2404_p2 = pnand %p2402_p1, %p2390_p8  ;;  %p2410_p6 = scmp.lt.s32.totalorder %s2408_s26, %s2401_s21 }
  0x6c   : > { %p2405_p5 = pneg %p2404_p2  ;;  %p2411_p12 = por %p2410_p6, %p2409_p9 }
  0x6e   : > { %p2412_p3 = pnand %p2411_p12, %p2405_p5 }
  0x70   : > { %2415 = shalt.err (!%p2412_p3)
}
  0x71   : > { %s3064_s13 = smov 8   ;;  %s3065_s9 = smov 128  }
  0x72   : > { %2029 = dma.hbm_to_vmem [thread:$0]  (!%p2700_p7), %s2698_s16, 1024, %s2704_s22, %s2706_s10, %s3065_s9, %s3065_s9, %s3064_s13  }
  0x73   : > { %p3066_p1 = scmp.ne.s32.totalorder %s3055_s12, 0 }
  0x74   : > { %s2733_s1 = sand.u32 (!%p3066_p1), 1, %s2484_s28   ;;  %p3067_p3 = scmp.ne.s32.totalorder (!%p3066_p1), %s3060_s25, 0 }
  0x75   : > { %338 = sbr.rel (%p3066_p1) target bundleno = 1636 (0x664), region = 52  ;;  %s1768_s2 = sshll.u32 (!%p3066_p1), %s2733_s1, 6 }
  0x76   : > { %s341_s17 = scalar_lea.sflag (!%p3066_p1), [#allocation3], %s2733_s1  ;;  %s2739_s15 = scalar_lea.vmem (!%p3066_p1), [#allocation2], %s1768_s2 }
  0x7a   : > { %2459 = dma.done.wait (%p3067_p3), %s341_s17, 1024  }
  0x7b   : > { %2461 = vsyncadd (%p3067_p3), %s341_s17, 4294966272  ;;  %p3068_p4 = scmp.eq.s32.totalorder %s2574_s11, 0 }
  0x7d   : > { %2463 = dma.done.wait (%p3068_p4), [#allocation6], 3072   ;;  %p3069_p12 = pmov %p3068_p4 }
  0x7e   : > { %p3070_p6 = pmov %p3068_p4 }
  0x7f   : > { %2465 = vsyncadd (%p3069_p12), [#allocation6], 4294964224 }
  0x80   : > { %2467 = dma.done.wait (%p3070_p6), [#allocation9], 3072   ;;  %p3071_p2 = pmov %p3068_p4 }
  0x82   : > { %2469 = vsyncadd (%p3071_p2), [#allocation9], 4294964224  ;;  %p3072_p7 = pmov %p3071_p2 }
  0x83   : > { %p3073_p8 = pmov %p3071_p2 }
  0x84   : > { %2471 = dma.done.wait (%p3072_p7), [#allocation12], 1024  }
  0x85   : > { %2473 = vsyncadd (%p3073_p8), [#allocation12], 4294966272  ;;  %v2090_v0 = vld [vmem:[#allocation5 + $0x38] sm:$0xff]   ;;  %v2091_v1 = vld [vmem:[#allocation5 + $0x30] sm:$0xff]   ;;  %v2504_v61 = vmov 0   ;;  %s396_s14 = scalar_lea.vmem [#allocation13], %s1768_s2 }
  0x86   : > { %1898 = vmatprep.subr.bf16.mxu0 %v2090_v0  ;;  %v2092_v2 = vld [vmem:[#allocation5 + $0x28] sm:$0xff]   ;;  %v2093_v3 = vld [vmem:[#allocation5 + $0x20] sm:$0xff]   ;;  %v2094_v7 = vld [vmem:[#allocation5 + $0x18] sm:$0xff]   ;;  %821 = vmatprep.mubr.bf16.mxu1 %v2504_v61  ;;  %s1635_s2 = sshll.u32 %s396_s14, 4  ;;  %s1861_s19 = sshll.u32 %s2574_s11, 10  ;;  %s2989_s2 = int_to_ptr.vmem [resolvable:$true] %s1635_s2 }
  0x87   : > { %1899 = vmatpush3.bf16.msra.mxu0 %v2090_v0  ;;  %v400_v4 = vld [vmem:[%s2739_s15] sm:$0xff]  ;;  %v401_v5 = vld [vmem:[%s2739_s15 + $0x8] sm:$0xff]  ;;  %v2095_v8 = vld [vmem:[#allocation5 + $0x10] sm:$0xff]   ;;  %s2995_s13 = scalar_lea.hbm %s3046_s8, %s1861_s19  ;;  %s1622_s9 = scalar_lea.sflag [#allocation4], %s2733_s1 }
  0x88   : > { %1900 = vmatprep.subr.bf16.mxu0 %v2091_v1  ;;  %v408_v6 = vpack.c.bf16 %v401_v5, %v400_v4  ;;  %v2096_v9 = vld [vmem:[#allocation5 + $0x8] sm:$0xff]   ;;  %v2097_v10 = vld [vmem:[#allocation5] sm:$0xff]   ;;  %v402_v11 = vld [vmem:[%s2739_s15 + $0x10] sm:$0xff]  ;;  %s2416_s11 = scalar_lea.vmem %s2989_s2, 1024  ;;  %p3074_p11 = scmp.ne.s32.totalorder %s3061_s20, 0 }
  0x89   : > { %v403_v12 = vld [vmem:[%s2739_s15 + $0x18] sm:$0xff]  ;;  %v404_v13 = vld [vmem:[%s2739_s15 + $0x20] sm:$0xff]  ;;  %v405_v14 = vld [vmem:[%s2739_s15 + $0x28] sm:$0xff]  ;;  %p2417_p10 = scmp.ne.s32.totalorder %s2989_s2, %s2416_s11  ;;  %s2505_s17 = smov [#allocation13]  }
  0x8a   : > { %1914 = vmatprep.mubr.bf16.mxu0 %v408_v6  ;;  %v409_v15 = vpack.c.bf16 %v403_v12, %v402_v11  ;;  %v410_v16 = vpack.c.bf16 %v405_v14, %v404_v13  ;;  %v406_v17 = vld [vmem:[%s2739_s15 + $0x30] sm:$0xff]  ;;  %v407_v18 = vld [vmem:[%s2739_s15 + $0x38] sm:$0xff]  ;;  %v1775_v21 = vld [vmem:[%s3044_s6] ss:$0 sm:$0xff]  ;;  %s2420_s15 = sshll.u32 %s2505_s17, 4  ;;  %s2421_s15 = int_to_ptr.vmem [resolvable:$false] %s2420_s15 }
  0x8b   : > { %1901 = vmatpush3.bf16.msra.mxu0 %v2091_v1  ;;  %v411_v19 = vpack.c.bf16 %v407_v18, %v406_v17  ;;  %v2098_v35 = vld [vmem:[#allocation7 + $0x74] ss:$8 sps:$4 sm:$0xff]   ;;  %v2100_v36 = vld [vmem:[#allocation7 + $0x70] ss:$8 sps:$4 sm:$0xff]   ;;  %v2101_v40 = vld [vmem:[#allocation7 + $0x64] ss:$8 sps:$4 sm:$0xff]   ;;  %p2418_p0 = pnand %p2417_p10, %p3074_p11  ;;  %p2423_p5 = scmp.lt.s32.totalorder %s2989_s2, %s2421_s15 }
  0x8c   : > { %1902 = vmatprep.subr.bf16.mxu0 %v2092_v2  ;;  %789 = vmatprep.subr.bf16.mxu1 %v2098_v35  ;;  %v2103_v41 = vld [vmem:[#allocation7 + $0x60] ss:$8 sps:$4 sm:$0xff]   ;;  %v2104_v44 = vld [vmem:[#allocation7 + $0x54] ss:$8 sps:$4 sm:$0xff]   ;;  %v2106_v45 = vld [vmem:[#allocation7 + $0x50] ss:$8 sps:$4 sm:$0xff]  }
  0x8d   : > { %790 = vmatpush1.bf16.msra.mxu1 %v2100_v36  ;;  %v2107_v48 = vld [vmem:[#allocation7 + $0x44] ss:$8 sps:$4 sm:$0xff]   ;;  %v2109_v49 = vld [vmem:[#allocation7 + $0x40] ss:$8 sps:$4 sm:$0xff]   ;;  %v2110_v52 = vld [vmem:[#allocation7 + $0x34] ss:$8 sps:$4 sm:$0xff]   ;;  %p2419_p13 = pneg %p2418_p0 }
  0x8e   : > { %791 = vmatprep.subr.bf16.mxu1 %v2101_v40  ;;  %v2112_v54 = vld [vmem:[#allocation7 + $0x30] ss:$8 sps:$4 sm:$0xff]   ;;  %v2113_v55 = vld [vmem:[#allocation7 + $0x24] ss:$8 sps:$4 sm:$0xff]   ;;  %v2115_v56 = vld [vmem:[#allocation7 + $0x20] ss:$8 sps:$4 sm:$0xff]  }
  0x8f   : > { %1903 = vmatpush3.bf16.msra.mxu0 %v2092_v2  ;;  %v2116_v57 = vld [vmem:[#allocation7 + $0x14] ss:$8 sps:$4 sm:$0xff]   ;;  %v2118_v58 = vld [vmem:[#allocation7 + $0x10] ss:$8 sps:$4 sm:$0xff]   ;;  %v2119_v59 = vld [vmem:[#allocation7 + $0x4] ss:$8 sps:$4 sm:$0xff]  }
  0x90   : > { %1904 = vmatprep.subr.bf16.mxu0 %v2093_v3  ;;  %v2121_v60 = vld [vmem:[#allocation7] ss:$8 sps:$4 sm:$0xff]   ;;  %s2422_s12 = scalar_lea.vmem %s2421_s15, 2048 }
  0x91   : > { %792 = vmatpush1.bf16.msra.mxu1 %v2103_v41  ;;  %p2424_p9 = scmp.lt.s32.totalorder %s2422_s12, %s2416_s11 }
  0x92   : > { %793 = vmatprep.subr.bf16.mxu1 %v2104_v44 }
  0x93   : > { %1905 = vmatpush3.bf16.msra.mxu0 %v2093_v3  ;;  %p2425_p1 = por %p2424_p9, %p2423_p5 }
  0x94   : > { %1906 = vmatprep.subr.bf16.mxu0 %v2094_v7 }
  0x95   : > { %794 = vmatpush1.bf16.msra.mxu1 %v2106_v45  ;;  %p2426_p3 = pnand %p2425_p1, %p2419_p13 }
  0x96   : > { %795 = vmatprep.subr.bf16.mxu1 %v2107_v48 }
  0x97   : > { %1907 = vmatpush3.bf16.msra.mxu0 %v2094_v7 }
  0x98   : > { %1908 = vmatprep.subr.bf16.mxu0 %v2095_v8 }
  0x99   : > { %796 = vmatpush1.bf16.msra.mxu1 %v2109_v49 }
  0x9a   : > { %797 = vmatprep.subr.bf16.mxu1 %v2110_v52  ;;  %v1784_v52 = vld [vmem:[%s3044_s6 + $0x1] ss:$0 sm:$0xff] }
  0x9b   : > { %1909 = vmatpush3.bf16.msra.mxu0 %v2095_v8 }
  0x9c   : > { %1910 = vmatprep.subr.bf16.mxu0 %v2096_v9 }
  0x9d   : > { %798 = vmatpush1.bf16.msra.mxu1 %v2112_v54 }
  0x9e   : > { %799 = vmatprep.subr.bf16.mxu1 %v2113_v55 }
  0x9f   : > { %1911 = vmatpush3.bf16.msra.mxu0 %v2096_v9 }
  0xa0   : > { %1912 = vmatprep.subr.bf16.mxu0 %v2097_v10 }
  0xa1   : > { %800 = vmatpush1.bf16.msra.mxu1 %v2115_v56 }
  0xa2   : > { %801 = vmatprep.subr.bf16.mxu1 %v2116_v57 }
  0xa3   : > { %1913 = vmatpush3.bf16.msra.mxu0 %v2097_v10 }
  0xa5   : > { %802 = vmatpush1.bf16.msra.mxu1 %v2118_v58 }
  0xa6   : > { %1915 = vmatmul.mubr.bf16.vlgmr.msra.gmra.mxu0 %v409_v15  ;;  %803 = vmatprep.subr.bf16.mxu1 %v2119_v59 }
  0xa7   : > { %1918 = vmatprep.mubr.bf16.mxu0 %v410_v16 }
  0xa9   : > { %804 = vmatpush1.bf16.msra.mxu1 %v2121_v60 }
  0xae   : > { %1919 = vmatmul.mubr.bf16.gmra.mxu0 %v411_v19 }
 0x166   : > { %v1916_v20 = vpop.f32.mrf.mxu0 }
 0x167   : > { %v2778_v31 = vadd.f32 %v1916_v20, %v1775_v21 }
 0x168   : > { %v515_v22 = vpop.f32.mrf.mxu0 }
 0x169   : > { %v2768_v23 = vadd.f32 %v1775_v21, %v515_v22  ;;  %v568_v34 = vmul.f32 %v2778_v31, %v2778_v31 }
 0x16a   : > { %v1917_v24 = vpop.f32.mrf.mxu0 }
 0x16b   : > { %550 = vadd.xlane.f32.xlu0 %v2768_v23  ;;  %v566_v25 = vmul.f32 %v2768_v23, %v2768_v23  ;;  %v2780_v32 = vadd.f32 %v1917_v24, %v1775_v21 }
 0x16c   : > { %v518_v26 = vpop.f32.mrf.mxu0 }
 0x16d   : > { %v2773_v27 = vadd.f32 %v1775_v21, %v518_v26  ;;  %574 = vadd.xlane.f32.xlu1 %v566_v25  ;;  %v569_v37 = vmul.f32 %v2780_v32, %v2780_v32 }
 0x16e   : > { %v1920_v28 = vpop.f32.mrf.mxu0 }
 0x16f   : > { %552 = vadd.xlane.f32.xlu0 %v2773_v27  ;;  %v567_v29 = vmul.f32 %v2773_v27, %v2773_v27  ;;  %v2798_v47 = vadd.f32 %v1920_v28, %v1775_v21 }
 0x170   : > { %v531_v30 = vpop.f32.mrf.mxu0 }
 0x171   : > { %576 = vadd.xlane.f32.xlu1 %v567_v29  ;;  %v2788_v39 = vadd.f32 %v1775_v21, %v531_v30  ;;  %v572_v51 = vmul.f32 %v2798_v47, %v2798_v47 }
 0x172   : > { %v1921_v33 = vpop.f32.mrf.mxu0 }
 0x173   : > { %554 = vadd.xlane.f32.xlu0 %v2778_v31  ;;  %v570_v43 = vmul.f32 %v2788_v39, %v2788_v39  ;;  %v2800_v50 = vadd.f32 %v1921_v33, %v1775_v21 }
 0x174   : > { %v534_v38 = vpop.f32.mrf.mxu0 }
 0x175   : > { %556 = vadd.xlane.f32.xlu1 %v2780_v32  ;;  %v2790_v42 = vadd.f32 %v1775_v21, %v534_v38  ;;  %v573_v53 = vmul.f32 %v2800_v50, %v2800_v50 }
 0x177   : > { %578 = vadd.xlane.f32.xlu0 %v568_v34  ;;  %v571_v46 = vmul.f32 %v2790_v42, %v2790_v42 }
 0x179   : > { %580 = vadd.xlane.f32.xlu1 %v569_v37 }
 0x17b   : > { %558 = vadd.xlane.f32.xlu0 %v2788_v39 }
 0x17d   : > { %560 = vadd.xlane.f32.xlu1 %v2790_v42 }
 0x17f   : > { %582 = vadd.xlane.f32.xlu0 %v570_v43 }
 0x181   : > { %584 = vadd.xlane.f32.xlu1 %v571_v46 }
 0x183   : > { %562 = vadd.xlane.f32.xlu0 %v2798_v47 }
 0x185   : > { %564 = vadd.xlane.f32.xlu1 %v2800_v50 }
 0x187   : > { %586 = vadd.xlane.f32.xlu0 %v572_v51 }
 0x189   : > { %588 = vadd.xlane.f32.xlu1 %v573_v53 }
 0x1f4   : > { %v551_v62 = vpop.xlane.xlu0 %550 }
 0x1f5   : > { %v590_v63 = vmul.f32 0.0078125, %v551_v62 }
 0x1f6   : > { %v575_v0 = vpop.xlane.xlu1 %574 }
 0x1f7   : > { %v606_v1 = vmul.f32 %v590_v63, %v590_v63  ;;  %v598_v2 = vmul.f32 0.0078125, %v575_v0  ;;  %v622_v38 = vsub.f32 %v2768_v23, %v590_v63  ;;  %v1785_v0 = vld [vmem:[%s3044_s6 + $0x2] ss:$0 sm:$0xff] }
 0x1f8   : > { %v553_v3 = vpop.xlane.xlu0 %552 }
 0x1f9   : > { %v614_v4 = vsub.f32 %v598_v2, %v606_v1  ;;  %v591_v5 = vmul.f32 0.0078125, %v553_v3 }
 0x1fa   : > { %v577_v6 = vpop.xlane.xlu1 %576 }
 0x1fb   : > { %v630_v7 = vadd.f32 1e-05, %v614_v4  ;;  %v607_v8 = vmul.f32 %v591_v5, %v591_v5  ;;  %v599_v9 = vmul.f32 0.0078125, %v577_v6  ;;  %v623_v54 = vsub.f32 %v2773_v27, %v591_v5 }
 0x1fc   : > { %v555_v10 = vpop.xlane.xlu0 %554 }
 0x1fd   : > { %2162 = vrsqrt.f32 %v630_v7  ;;  %v615_v11 = vsub.f32 %v599_v9, %v607_v8  ;;  %v592_v12 = vmul.f32 0.0078125, %v555_v10 }
 0x1fe   : > { %v557_v13 = vpop.xlane.xlu1 %556 }
 0x1ff   : > { %v631_v14 = vadd.f32 1e-05, %v615_v11  ;;  %v2809_v15 = vmul.f32 0.0078125, %v557_v13  ;;  %v608_v17 = vmul.f32 %v592_v12, %v592_v12  ;;  %v624_v3 = vsub.f32 %v2778_v31, %v592_v12 }
 0x200   : > { %v579_v16 = vpop.xlane.xlu0 %578 }
 0x201   : > { %2164 = vrsqrt.f32 %v631_v14  ;;  %v600_v18 = vmul.f32 0.0078125, %v579_v16  ;;  %v609_v20 = vmul.f32 %v2809_v15, %v2809_v15  ;;  %v625_v10 = vsub.f32 %v2780_v32, %v2809_v15 }
 0x202   : > { %v581_v19 = vpop.xlane.xlu1 %580 }
 0x203   : > { %v616_v21 = vsub.f32 %v600_v18, %v608_v17  ;;  %v601_v22 = vmul.f32 0.0078125, %v581_v19 }
 0x204   : > { %v559_v24 = vpop.xlane.xlu0 %558 }
 0x205   : > { %v632_v25 = vadd.f32 1e-05, %v616_v21  ;;  %v617_v26 = vsub.f32 %v601_v22, %v609_v20  ;;  %v2813_v28 = vmul.f32 0.0078125, %v559_v24 }
 0x206   : > { %v561_v29 = vpop.xlane.xlu1 %560 }
 0x207   : > { %2166 = vrsqrt.f32 %v632_v25  ;;  %v633_v30 = vadd.f32 1e-05, %v617_v26  ;;  %v595_v33 = vmul.f32 0.0078125, %v561_v29  ;;  %v610_v35 = vmul.f32 %v2813_v28, %v2813_v28 }
 0x208   : > { %v583_v34 = vpop.xlane.xlu0 %582  ;;  %v626_v21 = vsub.f32 %v2788_v39, %v2813_v28 }
 0x209   : > { %2168 = vrsqrt.f32 %v633_v30  ;;  %v602_v36 = vmul.f32 0.0078125, %v583_v34  ;;  %v611_v41 = vmul.f32 %v595_v33, %v595_v33  ;;  %v627_v25 = vsub.f32 %v2790_v42, %v595_v33 }
 0x20a   : > { %v2163_v37 = vpop.eup %2162  ;;  %v585_v40 = vpop.xlane.xlu1 %584 }
 0x20b   : > { %v618_v43 = vsub.f32 %v602_v36, %v610_v35  ;;  %v603_v44 = vmul.f32 0.0078125, %v585_v40  ;;  %v646_v46 = vmul.f32 %v2163_v37, %v622_v38 }
 0x20c   : > { %v563_v45 = vpop.xlane.xlu0 %562 }
 0x20d   : > { %v634_v48 = vadd.f32 1e-05, %v618_v43  ;;  %v619_v49 = vsub.f32 %v603_v44, %v611_v41  ;;  %v596_v51 = vmul.f32 0.0078125, %v563_v45  ;;  %v658_v60 = vmul.f32 %v1784_v52, %v646_v46 }
 0x20e   : > { %v2165_v53 = vpop.eup %2164  ;;  %v565_v55 = vpop.xlane.xlu1 %564 }
 0x20f   : > { %2170 = vrsqrt.f32 %v634_v48  ;;  %v635_v56 = vadd.f32 1e-05, %v619_v49  ;;  %v597_v57 = vmul.f32 0.0078125, %v565_v55  ;;  %v647_v59 = vmul.f32 %v2165_v53, %v623_v54  ;;  %v2123_v55 = vld [vmem:[#allocation8 + $0x30] sm:$0xff]  }
 0x210   : > { %v587_v58 = vpop.xlane.xlu0 %586  ;;  %v612_v62 = vmul.f32 %v596_v51, %v596_v51  ;;  %v670_v8 = vadd.f32 %v1785_v0, %v658_v60  ;;  %v628_v37 = vsub.f32 %v2798_v47, %v596_v51  ;;  %v2122_v51 = vld [vmem:[#allocation8 + $0x38] sm:$0xff]   ;;  %v2129_v60 = vld [vmem:[#allocation8] sm:$0xff]  }
 0x211   : > { %2172 = vrsqrt.f32 %v635_v56  ;;  %v604_v63 = vmul.f32 0.0078125, %v587_v58  ;;  %v659_v2 = vmul.f32 %v1784_v52, %v647_v59  ;;  %v613_v4 = vmul.f32 %v597_v57, %v597_v57  ;;  %1922 = vmatprep.subr.bf16.mxu0 %v2122_v51  ;;  %v2124_v56 = vld [vmem:[#allocation8 + $0x28] sm:$0xff]   ;;  %v2126_v58 = vld [vmem:[#allocation8 + $0x18] sm:$0xff]  }
 0x212   : > { %v589_v1 = vpop.xlane.xlu1 %588  ;;  %v629_v28 = vsub.f32 %v2800_v50, %v597_v57  ;;  %1923 = vmatpush3.bf16.msra.mxu0 %v2122_v51  ;;  %v2125_v57 = vld [vmem:[#allocation8 + $0x20] sm:$0xff]   ;;  %v2128_v59 = vld [vmem:[#allocation8 + $0x8] sm:$0xff]  }
 0x213   : > { %v620_v5 = vsub.f32 %v604_v63, %v612_v62  ;;  %v605_v6 = vmul.f32 0.0078125, %v589_v1  ;;  %v671_v9 = vadd.f32 %v1785_v0, %v659_v2  ;;  %1924 = vmatprep.subr.bf16.mxu0 %v2123_v55  ;;  %v699_v62 = vlaneseq  ;;  %v548_v1 = vld [vmem:[%s3045_s7] ss:$2 sm:$0x3] }
 0x214   : > { %v2167_v7 = vpop.eup %2166 }
 0x215   : > { %v636_v11 = vadd.f32 1e-05, %v620_v5  ;;  %v621_v13 = vsub.f32 %v605_v6, %v613_v4  ;;  %v648_v14 = vmul.f32 %v2167_v7, %v624_v3  ;;  %v678_v17 = vpack.c.bf16 %v671_v9, %v670_v8 }
 0x216   : > { %v2169_v16 = vpop.eup %2168  ;;  %1925 = vmatpush3.bf16.msra.mxu0 %v2123_v55  ;;  %v2837_v63 = vshrl.u32 %v699_v62, 7 }
 0x217   : > { %2174 = vrsqrt.f32 %v636_v11  ;;  %v637_v18 = vadd.f32 1e-05, %v621_v13  ;;  %v649_v19 = vmul.f32 %v2169_v16, %v625_v10  ;;  %v660_v20 = vmul.f32 %v1784_v52, %v648_v14  ;;  %822 = vmatmul.mubr.bf16.vlgmr.msra.gmra.mxu1 %v678_v17  ;;  %1926 = vmatprep.subr.bf16.mxu0 %v2124_v56 }
 0x218   : > { %831 = vmatprep.mubr.bf16.mxu1 %v2504_v61 }
 0x219   : > { %2176 = vrsqrt.f32 %v637_v18  ;;  %v661_v12 = vmul.f32 %v1784_v52, %v649_v19  ;;  %v672_v22 = vadd.f32 %v1785_v0, %v660_v20 }
 0x21a   : > { %1927 = vmatpush3.bf16.msra.mxu0 %v2124_v56 }
 0x21b   : > { %v673_v24 = vadd.f32 %v1785_v0, %v661_v12  ;;  %1928 = vmatprep.subr.bf16.mxu0 %v2125_v57 }
 0x21c   : > { %v2171_v15 = vpop.eup %2170 }
 0x21d   : > { %v679_v26 = vpack.c.bf16 %v673_v24, %v672_v22  ;;  %v650_v29 = vmul.f32 %v2171_v15, %v626_v21 }
 0x21e   : > { %v2173_v30 = vpop.eup %2172  ;;  %1929 = vmatpush3.bf16.msra.mxu0 %v2125_v57 }
 0x21f   : > { %v651_v34 = vmul.f32 %v2173_v30, %v627_v25  ;;  %v662_v35 = vmul.f32 %v1784_v52, %v650_v29  ;;  %832 = vmatmul.mubr.bf16.gmra.mxu1 %v679_v26  ;;  %1930 = vmatprep.subr.bf16.mxu0 %v2126_v58 }
 0x220   : > { %841 = vmatprep.mubr.bf16.mxu1 %v2504_v61 }
 0x221   : > { %v663_v36 = vmul.f32 %v1784_v52, %v651_v34  ;;  %v674_v38 = vadd.f32 %v1785_v0, %v662_v35 }
 0x222   : > { %1931 = vmatpush3.bf16.msra.mxu0 %v2126_v58 }
 0x223   : > { %v675_v40 = vadd.f32 %v1785_v0, %v663_v36 }
 0x224   : > { %v2175_v41 = vpop.eup %2174 }
 0x225   : > { %v680_v43 = vpack.c.bf16 %v675_v40, %v674_v38  ;;  %v652_v44 = vmul.f32 %v2175_v41, %v628_v37 }
 0x226   : > { %v2177_v45 = vpop.eup %2176 }
 0x227   : > { %v653_v33 = vmul.f32 %v2177_v45, %v629_v28  ;;  %v664_v46 = vmul.f32 %v1784_v52, %v652_v44  ;;  %842 = vmatmul.mubr.bf16.gmra.mxu1 %v680_v43 }
 0x228   : > { %851 = vmatprep.mubr.bf16.mxu1 %v2504_v61 }
 0x229   : > { %v665_v48 = vmul.f32 %v1784_v52, %v653_v33  ;;  %v676_v49 = vadd.f32 %v1785_v0, %v664_v46  ;;  %v2127_v52 = vld [vmem:[#allocation8 + $0x10] sm:$0xff]  }
 0x22a   : > { %1932 = vmatprep.subr.bf16.mxu0 %v2127_v52 }
 0x22b   : > { %v677_v53 = vadd.f32 %v1785_v0, %v665_v48  ;;  %1933 = vmatpush3.bf16.msra.mxu0 %v2127_v52  ;;  %v705_v0 = vsub.s32 1, %v2837_v63  ;;  %v701_v48 = vsub.s32 0, %v2837_v63 }
 0x22c   : > { %1934 = vmatprep.subr.bf16.mxu0 %v2128_v59 }
 0x22d   : > { %v681_v54 = vpack.c.bf16 %v677_v53, %v676_v49  ;;  %v706_v2 = vrot.slane %v548_v1, %v705_v0  ;;  %v702_v55 = vrot.slane %v548_v1, %v701_v48 }
 0x22f   : > { %852 = vmatmul.mubr.bf16.gmra.mxu1 %v681_v54  ;;  %1935 = vmatpush3.bf16.msra.mxu0 %v2128_v59 }
 0x230   : > { %1355 = vmatprep.mubr.bf16.mxu1 %v2504_v61  ;;  %1936 = vmatprep.subr.bf16.mxu0 %v2129_v60 }
 0x233   : > { %1937 = vmatpush3.bf16.msra.mxu0 %v2129_v60 }
 0x2d7   : > { %v823_v3 = vpop.f32.mrf.mxu1 }
 0x2d8   : > { %v824_v59 = vadd.f32 %v823_v3, %v702_v55 }
 0x2d9   : > { %v825_v4 = vpop.f32.mrf.mxu1 }
 0x2da   : > { %v826_v5 = vadd.f32 %v825_v4, %v706_v2 }
 0x2db   : > { %v827_v6 = vpop.f32.mrf.mxu1 }
 0x2dc   : > { %v1802_v7 = vmul.f32 -1.442695, %v826_v5  ;;  %v828_v60 = vadd.f32 %v827_v6, %v702_v55 }
 0x2dd   : > { %v829_v8 = vpop.f32.mrf.mxu1 }
 0x2de   : > { %2178 = vpow2.f32 %v1802_v7  ;;  %v830_v9 = vadd.f32 %v829_v8, %v706_v2 }
 0x2df   : > { %v2845_v10 = vpop.f32.mrf.mxu1 }
 0x2e0   : > { %v1803_v11 = vmul.f32 -1.442695, %v830_v9 }
 0x2e1   : > { %v835_v13 = vpop.f32.mrf.mxu1 }
 0x2e2   : > { %2180 = vpow2.f32 %v1803_v11  ;;  %v836_v14 = vadd.f32 %v835_v13, %v706_v2 }
 0x2e3   : > { %v2847_v16 = vpop.f32.mrf.mxu1 }
 0x2e4   : > { %v1804_v17 = vmul.f32 -1.442695, %v836_v14 }
 0x2e5   : > { %v839_v18 = vpop.f32.mrf.mxu1 }
 0x2e6   : > { %2182 = vpow2.f32 %v1804_v17  ;;  %v840_v19 = vadd.f32 %v839_v18, %v706_v2 }
 0x2e7   : > { %v2849_v20 = vpop.f32.mrf.mxu1 }
 0x2e8   : > { %v1805_v12 = vmul.f32 -1.442695, %v840_v19 }
 0x2e9   : > { %v845_v21 = vpop.f32.mrf.mxu1 }
 0x2ea   : > { %2184 = vpow2.f32 %v1805_v12  ;;  %v2851_v22 = vadd.f32 %v845_v21, %v706_v2  ;;  %v838_v21 = vadd.f32 %v2847_v16, %v702_v55 }
 0x2eb   : > { %v2179_v24 = vpop.eup %2178  ;;  %v2853_v15 = vpop.f32.mrf.mxu1 }
 0x2ec   : > { %v886_v25 = vadd.f32 1.0, %v2179_v24  ;;  %v1806_v26 = vmul.f32 -1.442695, %v2851_v22 }
 0x2ed   : > { %v849_v29 = vpop.f32.mrf.mxu1 }
 0x2ee   : > { %2186 = vrcp.f32 %v886_v25  ;;  %v850_v30 = vadd.f32 %v849_v29, %v706_v2 }
 0x2ef   : > { %v2181_v34 = vpop.eup %2180  ;;  %2188 = vpow2.f32 %v1806_v26  ;;  %v2856_v35 = vpop.f32.mrf.mxu1 }
 0x2f0   : > { %v887_v36 = vadd.f32 1.0, %v2181_v34  ;;  %v1807_v37 = vmul.f32 -1.442695, %v850_v30 }
 0x2f1   : > { %v855_v38 = vpop.f32.mrf.mxu1 }
 0x2f2   : > { %2190 = vrcp.f32 %v887_v36  ;;  %v856_v40 = vadd.f32 %v855_v38, %v706_v2  ;;  %v848_v36 = vadd.f32 %v2853_v15, %v702_v55 }
 0x2f3   : > { %v2183_v41 = vpop.eup %2182  ;;  %2192 = vpow2.f32 %v1807_v37  ;;  %v857_v28 = vpop.f32.mrf.mxu1 }
 0x2f4   : > { %v888_v43 = vadd.f32 1.0, %v2183_v41  ;;  %v1808_v44 = vmul.f32 -1.442695, %v856_v40 }
 0x2f5   : > { %v859_v45 = vpop.f32.mrf.mxu1 }
 0x2f6   : > { %2194 = vrcp.f32 %v888_v43  ;;  %v860_v33 = vadd.f32 %v859_v45, %v706_v2  ;;  %v858_v45 = vadd.f32 %v857_v28, %v702_v55 }
 0x2f7   : > { %v2185_v46 = vpop.eup %2184  ;;  %2196 = vpow2.f32 %v1808_v44  ;;  %v854_v44 = vadd.f32 %v2856_v35, %v702_v55 }
 0x2f8   : > { %v889_v49 = vadd.f32 1.0, %v2185_v46  ;;  %v1809_v53 = vmul.f32 -1.442695, %v860_v33 }
 0x2fa   : > { %2198 = vrcp.f32 %v889_v49 }
 0x2fb   : > { %v2187_v54 = vpop.eup %2186  ;;  %2200 = vpow2.f32 %v1809_v53 }
 0x2fc   : > { %v2189_v51 = vpop.eup %2188  ;;  %v910_v57 = vmul.f32 %v2187_v54, %v826_v5  ;;  %v834_v5 = vadd.f32 %v2845_v10, %v702_v55 }
 0x2fd   : > { %v890_v56 = vadd.f32 1.0, %v2189_v51 }
 0x2fe   : > { %v918_v4 = vmul.f32 %v910_v57, %v824_v59 }
 0x2ff   : > { %v2191_v58 = vpop.eup %2190  ;;  %2202 = vrcp.f32 %v890_v56 }
 0x300   : > { %v2193_v52 = vpop.eup %2192  ;;  %v911_v62 = vmul.f32 %v2191_v58, %v830_v9 }
 0x301   : > { %v891_v2 = vadd.f32 1.0, %v2193_v52 }
 0x302   : > { %v919_v7 = vmul.f32 %v911_v62, %v828_v60  ;;  %v2130_v60 = vld [vmem:[#allocation10 + $0x70] ss:$8 sps:$4 sm:$0xff]   ;;  %v2132_v62 = vld [vmem:[#allocation10 + $0x74] ss:$8 sps:$4 sm:$0xff]  }
 0x303   : > { %v2195_v8 = vpop.eup %2194  ;;  %2204 = vrcp.f32 %v891_v2  ;;  %1323 = vmatprep.subr.bf16.mxu1 %v2132_v62 }
 0x304   : > { %v2197_v11 = vpop.eup %2196  ;;  %v926_v13 = vpack.c.bf16 %v919_v7, %v918_v4  ;;  %v912_v18 = vmul.f32 %v2195_v8, %v836_v14  ;;  %v844_v14 = vadd.f32 %v2849_v20, %v702_v55  ;;  %1324 = vmatpush1.bf16.msra.mxu1 %v2130_v60 }
 0x305   : > { %v892_v17 = vadd.f32 1.0, %v2197_v11 }
 0x306   : > { %1938 = vmatprep.mubr.bf16.mxu0 %v926_v13  ;;  %v920_v9 = vmul.f32 %v912_v18, %v834_v5  ;;  %v2135_v13 = vld [vmem:[#allocation10 + $0x64] ss:$8 sps:$4 sm:$0xff]   ;;  %v2136_v5 = vld [vmem:[#allocation10 + $0x50] ss:$8 sps:$4 sm:$0xff]  }
 0x307   : > { %v2199_v12 = vpop.eup %2198  ;;  %2206 = vrcp.f32 %v892_v17  ;;  %v2133_v17 = vld [vmem:[#allocation10 + $0x60] ss:$8 sps:$4 sm:$0xff]   ;;  %1325 = vmatprep.subr.bf16.mxu1 %v2135_v13 }
 0x308   : > { %v2201_v1 = vpop.eup %2200  ;;  %v913_v3 = vmul.f32 %v2199_v12, %v840_v19  ;;  %1326 = vmatpush1.bf16.msra.mxu1 %v2133_v17 }
 0x309   : > { %v893_v6 = vadd.f32 1.0, %v2201_v1  ;;  %v2138_v1 = vld [vmem:[#allocation10 + $0x54] ss:$8 sps:$4 sm:$0xff]  }
 0x30a   : > { %v921_v24 = vmul.f32 %v913_v3, %v838_v21  ;;  %1327 = vmatprep.subr.bf16.mxu1 %v2138_v1 }
 0x30b   : > { %2208 = vrcp.f32 %v893_v6  ;;  %v2139_v6 = vld [vmem:[#allocation10 + $0x40] ss:$8 sps:$4 sm:$0xff]  }
 0x30c   : > { %v2203_v25 = vpop.eup %2202  ;;  %v927_v26 = vpack.c.bf16 %v921_v24, %v920_v9  ;;  %1328 = vmatpush1.bf16.msra.mxu1 %v2136_v5 }
 0x30d   : > { %v914_v29 = vmul.f32 %v2203_v25, %v2851_v22  ;;  %v2142_v25 = vld [vmem:[#allocation10 + $0x30] ss:$8 sps:$4 sm:$0xff]  }
 0x30e   : > { %1939 = vmatmul.mubr.bf16.vlgmr.msra.gmra.mxu0 %v927_v26 }
 0x30f   : > { %v922_v38 = vmul.f32 %v914_v29, %v844_v14  ;;  %v2147_v29 = vld [vmem:[#allocation10 + $0x24] ss:$8 sps:$4 sm:$0xff]   ;;  %v2150_v14 = vld [vmem:[#allocation10 + $0x14] ss:$8 sps:$4 sm:$0xff]  }
 0x310   : > { %v2205_v34 = vpop.eup %2204 }
 0x311   : > { %v915_v37 = vmul.f32 %v2205_v34, %v850_v30  ;;  %v1818_v30 = vld [vmem:[%s3044_s6 + $0x3] ss:$0 sm:$0xff] }
 0x312   : > { %v2145_v34 = vld [vmem:[#allocation10 + $0x20] ss:$8 sps:$4 sm:$0xff]  }
 0x313   : > { %v923_v10 = vmul.f32 %v915_v37, %v848_v36  ;;  %v2148_v36 = vld [vmem:[#allocation10 + $0x10] ss:$8 sps:$4 sm:$0xff]   ;;  %v2153_v37 = vld [vmem:[#allocation10 + $0x4] ss:$8 sps:$4 sm:$0xff]  }
 0x314   : > { %v2207_v41 = vpop.eup %2206 }
 0x315   : > { %v928_v16 = vpack.c.bf16 %v923_v10, %v922_v38  ;;  %v916_v19 = vmul.f32 %v2207_v41, %v856_v40  ;;  %v2151_v38 = vld [vmem:[#allocation10] ss:$8 sps:$4 sm:$0xff]  }
 0x317   : > { %1942 = vmatprep.mubr.bf16.mxu0 %v928_v16  ;;  %v924_v49 = vmul.f32 %v916_v19, %v854_v44 }
 0x318   : > { %v2209_v43 = vpop.eup %2208 }
 0x319   : > { %v917_v46 = vmul.f32 %v2209_v43, %v860_v33 }
 0x31b   : > { %v925_v53 = vmul.f32 %v917_v46, %v858_v45 }
 0x31d   : > { %v929_v22 = vpack.c.bf16 %v925_v53, %v924_v49 }
 0x31f   : > { %1943 = vmatmul.mubr.bf16.gmra.mxu0 %v929_v22 }
 0x3ce   : > { %v1940_v54 = vpop.f32.mrf.mxu0 }
 0x3cf   : > { %v1061_v28 = vadd.f32 %v1940_v54, %v2778_v31 }
 0x3d0   : > { %v1028_v20 = vpop.f32.mrf.mxu0 }
 0x3d1   : > { %v1059_v15 = vadd.f32 %v1028_v20, %v2768_v23  ;;  %v2881_v23 = vadd.f32 %v1818_v30, %v1061_v28 }
 0x3d2   : > { %v1941_v51 = vpop.f32.mrf.mxu0 }
 0x3d3   : > { %v2871_v40 = vadd.f32 %v1818_v30, %v1059_v15  ;;  %v1062_v57 = vadd.f32 %v1941_v51, %v2780_v32  ;;  %v1102_v52 = vmul.f32 %v2881_v23, %v2881_v23 }
 0x3d4   : > { %v1031_v56 = vpop.f32.mrf.mxu0 }
 0x3d5   : > { %v1060_v35 = vadd.f32 %v1031_v56, %v2773_v27  ;;  %1084 = vadd.xlane.f32.xlu0 %v2871_v40  ;;  %v1100_v55 = vmul.f32 %v2871_v40, %v2871_v40  ;;  %v2887_v27 = vadd.f32 %v1818_v30, %v1062_v57 }
 0x3d7   : > { %v2876_v33 = vadd.f32 %v1818_v30, %v1060_v35  ;;  %v1103_v4 = vmul.f32 %v2887_v27, %v2887_v27 }
 0x3d9   : > { %1108 = vadd.xlane.f32.xlu0 %v1100_v55  ;;  %1086 = vadd.xlane.f32.xlu1 %v2876_v33  ;;  %v1101_v58 = vmul.f32 %v2876_v33, %v2876_v33 }
 0x3dd   : > { %1088 = vadd.xlane.f32.xlu0 %v2881_v23  ;;  %1110 = vadd.xlane.f32.xlu1 %v1101_v58 }
 0x3df   : > { %v1944_v31 = vpop.f32.mrf.mxu0 }
 0x3e0   : > { %v1065_v18 = vadd.f32 %v1944_v31, %v2798_v47  ;;  %v2141_v47 = vld [vmem:[#allocation10 + $0x44] ss:$8 sps:$4 sm:$0xff]  }
 0x3e1   : > { %v1044_v59 = vpop.f32.mrf.mxu0  ;;  %1112 = vadd.xlane.f32.xlu0 %v1102_v52  ;;  %1090 = vadd.xlane.f32.xlu1 %v2887_v27 }
 0x3e2   : > { %v1063_v32 = vadd.f32 %v1044_v59, %v2788_v39  ;;  %v2905_v21 = vadd.f32 %v1818_v30, %v1065_v18  ;;  %1329 = vmatprep.subr.bf16.mxu1 %v2141_v47 }
 0x3e3   : > { %v1945_v2 = vpop.f32.mrf.mxu0  ;;  %1330 = vmatpush1.bf16.msra.mxu1 %v2139_v6 }
 0x3e4   : > { %v2895_v7 = vadd.f32 %v1818_v30, %v1063_v32  ;;  %v1106_v24 = vmul.f32 %v2905_v21, %v2905_v21 }
 0x3e5   : > { %v1047_v8 = vpop.f32.mrf.mxu0  ;;  %1114 = vadd.xlane.f32.xlu1 %v1103_v4 }
 0x3e6   : > { %v1064_v11 = vadd.f32 %v1047_v8, %v2790_v42  ;;  %1092 = vadd.xlane.f32.xlu0 %v2895_v7  ;;  %v1104_v39 = vmul.f32 %v2895_v7, %v2895_v7  ;;  %v1066_v42 = vadd.f32 %v1945_v2, %v2800_v50  ;;  %v2144_v50 = vld [vmem:[#allocation10 + $0x34] ss:$8 sps:$4 sm:$0xff]  }
 0x3e7   : > { %1331 = vmatprep.subr.bf16.mxu1 %v2144_v50 }
 0x3e8   : > { %v2900_v12 = vadd.f32 %v1818_v30, %v1064_v11  ;;  %v2911_v9 = vadd.f32 %v1818_v30, %v1066_v42  ;;  %1332 = vmatpush1.bf16.msra.mxu1 %v2142_v25 }
 0x3e9   : > { %1333 = vmatprep.subr.bf16.mxu1 %v2147_v29 }
 0x3ea   : > { %1116 = vadd.xlane.f32.xlu0 %v1104_v39  ;;  %1094 = vadd.xlane.f32.xlu1 %v2900_v12  ;;  %v1105_v3 = vmul.f32 %v2900_v12, %v2900_v12  ;;  %v1107_v26 = vmul.f32 %v2911_v9, %v2911_v9 }
 0x3ec   : > { %1334 = vmatpush1.bf16.msra.mxu1 %v2145_v34 }
 0x3ed   : > { %1335 = vmatprep.subr.bf16.mxu1 %v2150_v14 }
 0x3ee   : > { %1096 = vadd.xlane.f32.xlu0 %v2905_v21  ;;  %1118 = vadd.xlane.f32.xlu1 %v1105_v3 }
 0x3f0   : > { %1336 = vmatpush1.bf16.msra.mxu1 %v2148_v36 }
 0x3f1   : > { %1337 = vmatprep.subr.bf16.mxu1 %v2153_v37 }
 0x3f2   : > { %1120 = vadd.xlane.f32.xlu0 %v1106_v24  ;;  %1098 = vadd.xlane.f32.xlu1 %v2911_v9 }
 0x3f4   : > { %1338 = vmatpush1.bf16.msra.mxu1 %v2151_v38 }
 0x3f6   : > { %1122 = vadd.xlane.f32.xlu1 %v1107_v26  ;;  %v2926_v26 = vld [vmem:[%s3044_s6 + $0x4] ss:$0 sm:$0xff] }
 0x45e   : > { %v1085_v10 = vpop.xlane.xlu0 %1084 }
 0x45f   : > { %v1124_v41 = vmul.f32 0.0078125, %v1085_v10 }
 0x461   : > { %v1140_v43 = vmul.f32 %v1124_v41, %v1124_v41  ;;  %v1156_v39 = vsub.f32 %v2871_v40, %v1124_v41 }
 0x462   : > { %v1109_v16 = vpop.xlane.xlu0 %1108  ;;  %v1087_v19 = vpop.xlane.xlu1 %1086 }
 0x463   : > { %v1132_v44 = vmul.f32 0.0078125, %v1109_v16  ;;  %v1125_v45 = vmul.f32 0.0078125, %v1087_v19 }
 0x465   : > { %v1148_v46 = vsub.f32 %v1132_v44, %v1140_v43  ;;  %v1141_v54 = vmul.f32 %v1125_v45, %v1125_v45  ;;  %v1157_v29 = vsub.f32 %v2876_v33, %v1125_v45  ;;  %v1821_v44 = vld [vmem:[%s3044_s6 + $0x5] ss:$0 sm:$0xff] }
 0x466   : > { %v1089_v49 = vpop.xlane.xlu0 %1088  ;;  %v1111_v53 = vpop.xlane.xlu1 %1110 }
 0x467   : > { %v1164_v22 = vadd.f32 1e-05, %v1148_v46  ;;  %v1126_v20 = vmul.f32 0.0078125, %v1089_v49  ;;  %v1133_v15 = vmul.f32 0.0078125, %v1111_v53 }
 0x469   : > { %2210 = vrsqrt.f32 %v1164_v22  ;;  %v1149_v30 = vsub.f32 %v1133_v15, %v1141_v54  ;;  %v1142_v35 = vmul.f32 %v1126_v20, %v1126_v20  ;;  %v1158_v46 = vsub.f32 %v2881_v23, %v1126_v20 }
 0x46a   : > { %v1113_v51 = vpop.xlane.xlu0 %1112  ;;  %v1091_v56 = vpop.xlane.xlu1 %1090 }
 0x46b   : > { %v1165_v28 = vadd.f32 1e-05, %v1149_v30  ;;  %v1134_v55 = vmul.f32 0.0078125, %v1113_v51  ;;  %v1127_v57 = vmul.f32 0.0078125, %v1091_v56 }
 0x46d   : > { %2212 = vrsqrt.f32 %v1165_v28  ;;  %v1150_v58 = vsub.f32 %v1134_v55, %v1142_v35  ;;  %v1143_v59 = vmul.f32 %v1127_v57, %v1127_v57  ;;  %v1159_v28 = vsub.f32 %v2887_v27, %v1127_v57 }
 0x46e   : > { %v1115_v31 = vpop.xlane.xlu1 %1114 }
 0x46f   : > { %v1166_v52 = vadd.f32 1e-05, %v1150_v58  ;;  %v1093_v60 = vpop.xlane.xlu0 %1092  ;;  %v1135_v62 = vmul.f32 0.0078125, %v1115_v31 }
 0x470   : > { %v2918_v32 = vmul.f32 0.0078125, %v1093_v60 }
 0x471   : > { %2214 = vrsqrt.f32 %v1166_v52  ;;  %v1151_v2 = vsub.f32 %v1135_v62, %v1143_v59 }
 0x472   : > { %v1144_v13 = vmul.f32 %v2918_v32, %v2918_v32  ;;  %v1160_v62 = vsub.f32 %v2895_v7, %v2918_v32 }
 0x473   : > { %v1167_v4 = vadd.f32 1e-05, %v1151_v2  ;;  %v1117_v8 = vpop.xlane.xlu0 %1116  ;;  %v1095_v11 = vpop.xlane.xlu1 %1094 }
 0x474   : > { %v1136_v17 = vmul.f32 0.0078125, %v1117_v8  ;;  %v1129_v18 = vmul.f32 0.0078125, %v1095_v11 }
 0x475   : > { %2216 = vrsqrt.f32 %v1167_v4 }
 0x476   : > { %v2211_v1 = vpop.eup %2210  ;;  %v1152_v5 = vsub.f32 %v1136_v17, %v1144_v13  ;;  %v1145_v24 = vmul.f32 %v1129_v18, %v1129_v18  ;;  %v1161_v13 = vsub.f32 %v2900_v12, %v1129_v18 }
 0x477   : > { %v1180_v42 = vmul.f32 %v2211_v1, %v1156_v39  ;;  %v1097_v3 = vpop.xlane.xlu0 %1096  ;;  %v1119_v47 = vpop.xlane.xlu1 %1118 }
 0x478   : > { %v1168_v6 = vadd.f32 1e-05, %v1152_v5  ;;  %v1130_v50 = vmul.f32 0.0078125, %v1097_v3  ;;  %v1137_v25 = vmul.f32 0.0078125, %v1119_v47 }
 0x479   : > { %v1192_v10 = vmul.f32 %v2926_v26, %v1180_v42 }
 0x47a   : > { %v2213_v34 = vpop.eup %2212  ;;  %2218 = vrsqrt.f32 %v1168_v6  ;;  %v1153_v14 = vsub.f32 %v1137_v25, %v1145_v24  ;;  %v1146_v41 = vmul.f32 %v1130_v50, %v1130_v50  ;;  %v1162_v5 = vsub.f32 %v2905_v21, %v1130_v50 }
 0x47b   : > { %v1181_v36 = vmul.f32 %v2213_v34, %v1157_v29  ;;  %v1121_v37 = vpop.xlane.xlu0 %1120  ;;  %v1099_v38 = vpop.xlane.xlu1 %1098  ;;  %v1204_v54 = vadd.f32 %v1821_v44, %v1192_v10  ;;  %v2155_v10 = vld [vmem:[#allocation11 + $0x30] sm:$0xff]  }
 0x47c   : > { %v1169_v16 = vadd.f32 1e-05, %v1153_v14  ;;  %v1138_v19 = vmul.f32 0.0078125, %v1121_v37  ;;  %v1131_v43 = vmul.f32 0.0078125, %v1099_v38  ;;  %v2154_v38 = vld [vmem:[#allocation11 + $0x38] sm:$0xff]  }
 0x47d   : > { %v1193_v45 = vmul.f32 %v2926_v26, %v1181_v36  ;;  %1946 = vmatprep.subr.bf16.mxu0 %v2154_v38  ;;  %1970 = vmatprep.subr.bf16.mxu1 %v2154_v38 }
 0x47e   : > { %v2215_v49 = vpop.eup %2214  ;;  %2220 = vrsqrt.f32 %v1169_v16  ;;  %v1154_v53 = vsub.f32 %v1138_v19, %v1146_v41  ;;  %v1147_v56 = vmul.f32 %v1131_v43, %v1131_v43  ;;  %v1163_v24 = vsub.f32 %v2911_v9, %v1131_v43  ;;  %1947 = vmatpush3.bf16.msra.mxu0 %v2154_v38  ;;  %v2156_v41 = vld [vmem:[#allocation11 + $0x28] sm:$0xff]   ;;  %v2159_v16 = vld [vmem:[#allocation11 + $0x10] sm:$0xff]   ;;  %v2161_v43 = vld [vmem:[#allocation11] sm:$0xff]  }
 0x47f   : > { %v1123_v22 = vpop.xlane.xlu1 %1122  ;;  %v1205_v15 = vadd.f32 %v1821_v44, %v1193_v45  ;;  %v1182_v30 = vmul.f32 %v2215_v49, %v1158_v46  ;;  %1948 = vmatprep.subr.bf16.mxu0 %v2155_v10  ;;  %v2160_v19 = vld [vmem:[#allocation11 + $0x8] sm:$0xff]  }
 0x480   : > { %v1170_v51 = vadd.f32 1e-05, %v1154_v53  ;;  %v1139_v35 = vmul.f32 0.0078125, %v1123_v22 }
 0x481   : > { %v1212_v55 = vpack.c.bf16 %v1205_v15, %v1204_v54  ;;  %v1194_v52 = vmul.f32 %v2926_v26, %v1182_v30 }
 0x482   : > { %v2217_v58 = vpop.eup %2216  ;;  %2222 = vrsqrt.f32 %v1170_v51  ;;  %v1155_v31 = vsub.f32 %v1139_v35, %v1147_v56  ;;  %1949 = vmatpush3.bf16.msra.mxu0 %v2155_v10 }
 0x483   : > { %1356 = vmatmul.mubr.bf16.vlgmr.msra.gmra.mxu1 %v1212_v55  ;;  %v1183_v20 = vmul.f32 %v2217_v58, %v1159_v28  ;;  %v1206_v4 = vadd.f32 %v1821_v44, %v1194_v52  ;;  %1950 = vmatprep.subr.bf16.mxu0 %v2156_v41 }
 0x484   : > { %v1171_v59 = vadd.f32 1e-05, %v1155_v31  ;;  %1365 = vmatprep.mubr.bf16.mxu1 %v2504_v61  ;;  %1978 = vmatpush3.bf16.msra.mxu1 %v2154_v38 }
 0x485   : > { %v1195_v60 = vmul.f32 %v2926_v26, %v1183_v20  ;;  %1971 = vmatprep.subr.bf16.mxu1 %v2155_v10 }
 0x486   : > { %2224 = vrsqrt.f32 %v1171_v59  ;;  %1951 = vmatpush3.bf16.msra.mxu0 %v2156_v41 }
 0x487   : > { %v2219_v2 = vpop.eup %2218  ;;  %v1207_v57 = vadd.f32 %v1821_v44, %v1195_v60 }
 0x488   : > { %v1184_v8 = vmul.f32 %v2219_v2, %v1160_v62  ;;  %1979 = vmatpush3.bf16.msra.mxu1 %v2155_v10 }
 0x489   : > { %v1213_v11 = vpack.c.bf16 %v1207_v57, %v1206_v4  ;;  %1972 = vmatprep.subr.bf16.mxu1 %v2156_v41 }
 0x48a   : > { %v1196_v1 = vmul.f32 %v2926_v26, %v1184_v8 }
 0x48b   : > { %v2221_v17 = vpop.eup %2220  ;;  %1366 = vmatmul.mubr.bf16.gmra.mxu1 %v1213_v11 }
 0x48c   : > { %1375 = vmatprep.mubr.bf16.mxu1 %v2504_v61  ;;  %v1185_v39 = vmul.f32 %v2221_v17, %v1161_v13  ;;  %v1208_v3 = vadd.f32 %v1821_v44, %v1196_v1  ;;  %1980 = vmatpush3.bf16.msra.mxu1 %v2156_v41 }
 0x48e   : > { %v1197_v42 = vmul.f32 %v2926_v26, %v1185_v39 }
 0x48f   : > { %v2223_v32 = vpop.eup %2222 }
 0x490   : > { %v1209_v47 = vadd.f32 %v1821_v44, %v1197_v42  ;;  %v1186_v6 = vmul.f32 %v2223_v32, %v1162_v5 }
 0x492   : > { %v1214_v25 = vpack.c.bf16 %v1209_v47, %v1208_v3  ;;  %v1198_v34 = vmul.f32 %v2926_v26, %v1186_v6 }
 0x493   : > { %v2225_v29 = vpop.eup %2224 }
 0x494   : > { %1376 = vmatmul.mubr.bf16.gmra.mxu1 %v1214_v25  ;;  %v1187_v18 = vmul.f32 %v2225_v29, %v1163_v24  ;;  %v1210_v36 = vadd.f32 %v1821_v44, %v1198_v34 }
 0x495   : > { %1385 = vmatprep.mubr.bf16.mxu1 %v2504_v61  ;;  %v2157_v61 = vld [vmem:[#allocation11 + $0x20] sm:$0xff]  }
 0x496   : > { %v1199_v14 = vmul.f32 %v2926_v26, %v1187_v18  ;;  %1952 = vmatprep.subr.bf16.mxu0 %v2157_v61  ;;  %1973 = vmatprep.subr.bf16.mxu1 %v2157_v61  ;;  %v2158_v26 = vld [vmem:[#allocation11 + $0x18] sm:$0xff]  }
 0x497   : > { %1953 = vmatpush3.bf16.msra.mxu0 %v2157_v61  ;;  %1981 = vmatpush3.bf16.msra.mxu1 %v2157_v61 }
 0x498   : > { %v1211_v50 = vadd.f32 %v1821_v44, %v1199_v14  ;;  %1954 = vmatprep.subr.bf16.mxu0 %v2158_v26  ;;  %1974 = vmatprep.subr.bf16.mxu1 %v2158_v26  ;;  %v1819_v44 = vld [vmem:[%s3045_s7 + $0x1] ss:$2 sm:$0x3] }
 0x499   : > { %v1240_v46 = vrot.slane %v1819_v44, %v705_v0 }
 0x49a   : > { %v1215_v37 = vpack.c.bf16 %v1211_v50, %v1210_v36  ;;  %v1236_v50 = vrot.slane %v1819_v44, %v701_v48 }
 0x49b   : > { %1955 = vmatpush3.bf16.msra.mxu0 %v2158_v26  ;;  %1982 = vmatpush3.bf16.msra.mxu1 %v2158_v26 }
 0x49c   : > { %1386 = vmatmul.mubr.bf16.gmra.mxu1 %v1215_v37  ;;  %1956 = vmatprep.subr.bf16.mxu0 %v2159_v16 }
 0x49d   : > { %1975 = vmatprep.subr.bf16.mxu1 %v2159_v16 }
 0x49f   : > { %1957 = vmatpush3.bf16.msra.mxu0 %v2159_v16  ;;  %1983 = vmatpush3.bf16.msra.mxu1 %v2159_v16 }
 0x4a0   : > { %1958 = vmatprep.subr.bf16.mxu0 %v2160_v19  ;;  %1976 = vmatprep.subr.bf16.mxu1 %v2160_v19 }
 0x4a3   : > { %1959 = vmatpush3.bf16.msra.mxu0 %v2160_v19  ;;  %1984 = vmatpush3.bf16.msra.mxu1 %v2160_v19 }
 0x4a4   : > { %1960 = vmatprep.subr.bf16.mxu0 %v2161_v43  ;;  %1977 = vmatprep.subr.bf16.mxu1 %v2161_v43 }
 0x4a7   : > { %1961 = vmatpush3.bf16.msra.mxu0 %v2161_v43  ;;  %1985 = vmatpush3.bf16.msra.mxu1 %v2161_v43 }
 0x543   : > { %v1357_v45 = vpop.f32.mrf.mxu1 }
 0x544   : > { %v1358_v61 = vadd.f32 %v1357_v45, %v1236_v50 }
 0x545   : > { %v1359_v49 = vpop.f32.mrf.mxu1 }
 0x546   : > { %v1360_v53 = vadd.f32 %v1359_v49, %v1240_v46 }
 0x547   : > { %v1361_v22 = vpop.f32.mrf.mxu1 }
 0x548   : > { %v1838_v54 = vmul.f32 -1.442695, %v1360_v53  ;;  %v1362_v26 = vadd.f32 %v1361_v22, %v1236_v50 }
 0x549   : > { %v1363_v15 = vpop.f32.mrf.mxu1 }
 0x54a   : > { %2226 = vpow2.f32 %v1838_v54  ;;  %v1364_v30 = vadd.f32 %v1363_v15, %v1240_v46 }
 0x54b   : > { %v2955_v51 = vpop.f32.mrf.mxu1 }
 0x54c   : > { %v1839_v56 = vmul.f32 -1.442695, %v1364_v30  ;;  %v1368_v44 = vadd.f32 %v2955_v51, %v1236_v50 }
 0x54d   : > { %v1369_v35 = vpop.f32.mrf.mxu1 }
 0x54e   : > { %2228 = vpow2.f32 %v1839_v56  ;;  %v1370_v28 = vadd.f32 %v1369_v35, %v1240_v46 }
 0x54f   : > { %v2957_v55 = vpop.f32.mrf.mxu1 }
 0x550   : > { %v1840_v58 = vmul.f32 -1.442695, %v1370_v28 }
 0x551   : > { %v1373_v31 = vpop.f32.mrf.mxu1 }
 0x552   : > { %2230 = vpow2.f32 %v1840_v58  ;;  %v1374_v0 = vadd.f32 %v1373_v31, %v1240_v46 }
 0x554   : > { %v1841_v20 = vmul.f32 -1.442695, %v1374_v0  ;;  %v2959_v52 = vpop.f32.mrf.mxu1 }
 0x556   : > { %2232 = vpow2.f32 %v1841_v20  ;;  %v1379_v59 = vpop.f32.mrf.mxu1 }
 0x557   : > { %v2227_v60 = vpop.eup %2226  ;;  %v2961_v62 = vadd.f32 %v1379_v59, %v1240_v46 }
 0x558   : > { %v1420_v2 = vadd.f32 1.0, %v2227_v60  ;;  %v2963_v4 = vpop.f32.mrf.mxu1 }
 0x559   : > { %v1842_v57 = vmul.f32 -1.442695, %v2961_v62 }
 0x55a   : > { %2234 = vrcp.f32 %v1420_v2  ;;  %v1383_v8 = vpop.f32.mrf.mxu1  ;;  %v1382_v2 = vadd.f32 %v2963_v4, %v1236_v50 }
 0x55b   : > { %v2229_v11 = vpop.eup %2228  ;;  %2236 = vpow2.f32 %v1842_v57  ;;  %v1384_v13 = vadd.f32 %v1383_v8, %v1240_v46 }
 0x55c   : > { %v1421_v17 = vadd.f32 1.0, %v2229_v11  ;;  %v2966_v39 = vpop.f32.mrf.mxu1 }
 0x55d   : > { %v1843_v1 = vmul.f32 -1.442695, %v1384_v13 }
 0x55e   : > { %2238 = vrcp.f32 %v1421_v17  ;;  %v1389_v5 = vpop.f32.mrf.mxu1 }
 0x55f   : > { %v2231_v42 = vpop.eup %2230  ;;  %2240 = vpow2.f32 %v1843_v1  ;;  %v1390_v32 = vadd.f32 %v1389_v5, %v1240_v46  ;;  %v1388_v1 = vadd.f32 %v2966_v39, %v1236_v50 }
 0x560   : > { %v1422_v3 = vadd.f32 1.0, %v2231_v42  ;;  %v1391_v47 = vpop.f32.mrf.mxu1 }
 0x561   : > { %v1844_v6 = vmul.f32 -1.442695, %v1390_v32  ;;  %v1392_v5 = vadd.f32 %v1391_v47, %v1236_v50 }
 0x562   : > { %2242 = vrcp.f32 %v1422_v3  ;;  %v1393_v24 = vpop.f32.mrf.mxu1 }
 0x563   : > { %v2233_v25 = vpop.eup %2232  ;;  %2244 = vpow2.f32 %v1844_v6  ;;  %v1394_v29 = vadd.f32 %v1393_v24, %v1240_v46 }
 0x564   : > { %v1423_v18 = vadd.f32 1.0, %v2233_v25 }
 0x565   : > { %v1845_v34 = vmul.f32 -1.442695, %v1394_v29 }
 0x566   : > { %2246 = vrcp.f32 %v1423_v18 }
 0x567   : > { %v2235_v14 = vpop.eup %2234  ;;  %2248 = vpow2.f32 %v1845_v34 }
 0x568   : > { %v2237_v36 = vpop.eup %2236  ;;  %v1444_v38 = vmul.f32 %v2235_v14, %v1360_v53  ;;  %v1372_v53 = vadd.f32 %v2957_v55, %v1236_v50 }
 0x569   : > { %v1424_v37 = vadd.f32 1.0, %v2237_v36 }
 0x56a   : > { %v1452_v43 = vmul.f32 %v1444_v38, %v1358_v61 }
 0x56b   : > { %v2239_v10 = vpop.eup %2238  ;;  %2250 = vrcp.f32 %v1424_v37 }
 0x56c   : > { %v2241_v41 = vpop.eup %2240  ;;  %v1445_v16 = vmul.f32 %v2239_v10, %v1364_v30 }
 0x56d   : > { %v1425_v19 = vadd.f32 1.0, %v2241_v41 }
 0x56e   : > { %v1453_v46 = vmul.f32 %v1445_v16, %v1362_v26 }
 0x56f   : > { %v2243_v49 = vpop.eup %2242  ;;  %2252 = vrcp.f32 %v1425_v19 }
 0x570   : > { %v2245_v54 = vpop.eup %2244  ;;  %v1460_v15 = vpack.c.bf16 %v1453_v46, %v1452_v43  ;;  %v1446_v35 = vmul.f32 %v2243_v49, %v1370_v28  ;;  %v1378_v28 = vadd.f32 %v2959_v52, %v1236_v50  ;;  %v1854_v52 = vld [vmem:[%s3044_s6 + $0x6] ss:$0 sm:$0xff] }
 0x571   : > { %v1426_v56 = vadd.f32 1.0, %v2245_v54 }
 0x572   : > { %1962 = vmatprep.mubr.bf16.mxu0 %v1460_v15  ;;  %v1454_v30 = vmul.f32 %v1446_v35, %v1368_v44 }
 0x573   : > { %v2247_v63 = vpop.eup %2246  ;;  %2254 = vrcp.f32 %v1426_v56 }
 0x574   : > { %v2249_v48 = vpop.eup %2248  ;;  %v1447_v45 = vmul.f32 %v2247_v63, %v1374_v0 }
 0x575   : > { %v1427_v22 = vadd.f32 1.0, %v2249_v48 }
 0x576   : > { %v1455_v58 = vmul.f32 %v1447_v45, %v1372_v53 }
 0x577   : > { %2256 = vrcp.f32 %v1427_v22 }
 0x578   : > { %v2251_v31 = vpop.eup %2250  ;;  %v1461_v20 = vpack.c.bf16 %v1455_v58, %v1454_v30 }
 0x579   : > { %v1448_v59 = vmul.f32 %v2251_v31, %v2961_v62 }
 0x57a   : > { %1963 = vmatmul.mubr.bf16.vlgmr.msra.gmra.mxu0 %v1461_v20 }
 0x57b   : > { %v1456_v8 = vmul.f32 %v1448_v59, %v1378_v28 }
 0x57c   : > { %v2253_v60 = vpop.eup %2252 }
 0x57d   : > { %v1449_v57 = vmul.f32 %v2253_v60, %v1384_v13 }
 0x57f   : > { %v1457_v51 = vmul.f32 %v1449_v57, %v1382_v2 }
 0x580   : > { %v2255_v11 = vpop.eup %2254 }
 0x581   : > { %v1462_v55 = vpack.c.bf16 %v1457_v51, %v1456_v8  ;;  %v1450_v0 = vmul.f32 %v2255_v11, %v1390_v32 }
 0x583   : > { %1966 = vmatprep.mubr.bf16.mxu1 %v1462_v55  ;;  %v1458_v3 = vmul.f32 %v1450_v0, %v1388_v1 }
 0x584   : > { %v2257_v17 = vpop.eup %2256 }
 0x585   : > { %v1451_v42 = vmul.f32 %v2257_v17, %v1394_v29 }
 0x587   : > { %v1459_v62 = vmul.f32 %v1451_v42, %v1392_v5 }
 0x589   : > { %v1463_v6 = vpack.c.bf16 %v1459_v62, %v1458_v3 }
 0x58b   : > { %1967 = vmatmul.mubr.bf16.vlgmr.msra.gmra.mxu1 %v1463_v6 }
 0x63a   : > { %v1964_v4 = vpop.f32.mrf.mxu0 }
 0x63b   : > { %v1595_v13 = vadd.f32 %v1964_v4, %v2881_v23 }
 0x63c   : > { %v1562_v24 = vpop.f32.mrf.mxu0 }
 0x63d   : > { %v1607_v32 = vadd.f32 %v1854_v52, %v1595_v13  ;;  %v1593_v25 = vadd.f32 %v1562_v24, %v2871_v40 }
 0x63e   : > { %v1965_v18 = vpop.f32.mrf.mxu0 }
 0x63f   : > { %1615 = vst [vmem:[%s396_s14 + $0x10] sm:$0xff] %v1607_v32  ;;  %v1605_v39 = vadd.f32 %v1854_v52, %v1593_v25  ;;  %v1596_v47 = vadd.f32 %v1965_v18, %v2887_v27 }
 0x640   : > { %v1565_v29 = vpop.f32.mrf.mxu0 }
 0x641   : > { %1613 = vst [vmem:[%s396_s14] sm:$0xff] %v1605_v39  ;;  %v1608_v34 = vadd.f32 %v1854_v52, %v1596_v47  ;;  %v1594_v14 = vadd.f32 %v1565_v29, %v2876_v33 }
 0x643   : > { %1616 = vst [vmem:[%s396_s14 + $0x18] sm:$0xff] %v1608_v34  ;;  %v1606_v36 = vadd.f32 %v1854_v52, %v1594_v14 }
 0x645   : > { %1614 = vst [vmem:[%s396_s14 + $0x8] sm:$0xff] %v1606_v36 }
 0x64b   : > { %v1968_v23 = vpop.f32.mrf.mxu1 }
 0x64c   : > { %v1599_v50 = vadd.f32 %v1968_v23, %v2905_v21 }
 0x64d   : > { %v1578_v40 = vpop.f32.mrf.mxu1 }
 0x64e   : > { %v1611_v37 = vadd.f32 %v1854_v52, %v1599_v50  ;;  %v1597_v38 = vadd.f32 %v1578_v40, %v2895_v7 }
 0x64f   : > { %v1969_v10 = vpop.f32.mrf.mxu1 }
 0x650   : > { %1619 = vst [vmem:[%s396_s14 + $0x30] sm:$0xff] %v1611_v37  ;;  %v1609_v27 = vadd.f32 %v1854_v52, %v1597_v38  ;;  %v1600_v41 = vadd.f32 %v1969_v10, %v2911_v9 }
 0x651   : > { %v1581_v33 = vpop.f32.mrf.mxu1 }
 0x652   : > { %1617 = vst [vmem:[%s396_s14 + $0x20] sm:$0xff] %v1609_v27  ;;  %v1612_v21 = vadd.f32 %v1854_v52, %v1600_v41  ;;  %v1598_v61 = vadd.f32 %v1581_v33, %v2900_v12 }
 0x654   : > { %1620 = vst [vmem:[%s396_s14 + $0x38] sm:$0xff] %v1612_v21  ;;  %v1610_v7 = vadd.f32 %v1854_v52, %v1598_v61 }
 0x656   : > { %1618 = vst [vmem:[%s396_s14 + $0x28] sm:$0xff] %v1610_v7 }
 0x657   : > { %2429 = shalt.err (!%p2426_p3)
}
 0x658   : > { %s2430_s10 = scalar_lea.hbm %s2995_s13, 1024  ;;  %s2434_s22 = scalar_lea.hbm %s3046_s8, 2048 }
 0x659   : > { %p2431_p4 = scmp.ne.s32.totalorder %s2995_s13, %s2430_s10  ;;  %p2435_p2 = scmp.lt.s32.totalorder %s2995_s13, %s3046_s8 }
 0x65a   : > { %p2436_p7 = scmp.lt.s32.totalorder %s2434_s22, %s2430_s10 }
 0x65b   : > { %p2432_p12 = pnand %p2431_p4, %p3074_p11 }
 0x65c   : > { %p2437_p8 = por %p2436_p7, %p2435_p2 }
 0x65d   : > { %p2433_p6 = pneg %p2432_p12 }
 0x65f   : > { %p2438_p10 = pnand %p2437_p8, %p2433_p6 }
 0x661   : > { %2441 = shalt.err (!%p2438_p10)
}
 0x662   : > { %s2506_s21 = smov 128   ;;  %s2507_s26 = smov 8  }
 0x663   : > { %2008 = dma.vmem_to_hbm [thread:$0]  (%p3074_p11), %s2989_s2, 1024, %s2995_s13, %s1622_s9, %s2506_s21, %s2506_s21, %s2507_s26  }
 0x664 PF: > { %s1650_s11 = sand.u32 1, %s2480_s27   ;;  %p3075_p0 = scmp.ne.s32.totalorder %s3062_s24, 0 }
 0x665   : > { %p3076_p13 = scmp.ge.s32.totalorder %s2492_s30, 2  ;;  %s1651_s17 = scalar_lea.sflag [#allocation4], %s1650_s11 }
 0x667   : > { %p2031_p5 = pnand %p3076_p13, %p3075_p0 }
 0x669   : > { %p2032_p9 = pneg %p2031_p5 }
 0x66b   : > { %2475 = dma.done.wait (%p2032_p9), %s1651_s17, 1024  }
 0x66c   : > { %2477 = vsyncadd (%p2032_p9), %s1651_s17, 4294966272  ;;  %p24_p1 = scmp.ge.s32.totalorder %s2664_s18, 4   ;;  %s3077_s27 = smov %s2484_s28 }
 0x66d   : > { %s3078_s28 = smov %s2488_s29  ;;  %s3079_s29 = smov %s2676_s23 }
 0x66e   : > { %s3080_s30 = smov %s2664_s18  ;;  %26 = sbr.rel (!%p24_p1) target bundleno = 11 (0xb), region = 118 }
 0x673   :  { %1656 = vsyncpa [#allocation3], 1 }
 0x674   :  { %1658 = vsyncpa [#allocation3 + $0x1], 1 }
 0x675   :  { %1659 = vsyncpa [#allocation6], 1 }
 0x676   :  { %1660 = vsyncpa [#allocation9], 1 }
 0x677   :  { %1661 = vsyncpa [#allocation12], 1 }
 0x678   :  { %1662 = vsyncpa [#allocation4], 1 }
 0x679   :  { %1664 = vsyncpa [#allocation4 + $0x1], 1 }

</bundles_post_ra>
